<compile_context>
chip_gen: v6e
topology: v6e:2x2x1
jax: 0.10.0
libtpu: 0.0.40
codegen_flags: <defaults>
</compile_context>

<pallas_src>
import functools

import jax
import jax.numpy as jnp
from jax.experimental import pallas as pl
from jax.experimental.pallas import tpu as pltpu

# ----------------------------- model config --------------------------------
FEATURE_DIMS = (10, 12, 8, 6)          # 4 sparse fields
NUM_FIELDS = len(FEATURE_DIMS)
EMBED_DIM = 8
EMBED_OUT = NUM_FIELDS * EMBED_DIM     # 32
NUM_SHARED = 2
NUM_SPECIFIC = 2
EXPERTS_DIMS = ((32,), (16,))          # 2 CGC layers
TOWER_DIMS = ((8,), (8,))
TASK_TYPES = ("binary", "regression")
TASK_NUM = len(TASK_TYPES)
LAYER_NUM = len(EXPERTS_DIMS)
TIME_DIM = 9
ATT_DIM = 64
ATT_HEADS = 2
ATT_LAYERS = 3
BN_EPS = 1e-5
TOTAL_FEATS = sum(FEATURE_DIMS)

# the fused kernel hard-codes the 2-task / 2-layer structure
assert TASK_NUM == 2 and LAYER_NUM == 2

# powers of two -> use shifts/ands in-kernel (guaranteed Mosaic lowering)
LOG2_F = NUM_FIELDS.bit_length() - 1
LOG2_E = EMBED_DIM.bit_length() - 1
assert NUM_FIELDS == 1 << LOG2_F and EMBED_DIM == 1 << LOG2_E

# bias-slab row layout (one (BIAS_ROWS, BIAS_W) slab holds every bias)
BIAS_W = 256
BR_ER = 0                               # [att_embed_b | att_res_b]        (128)
BR_QKV = 1                              # per att layer fused qkv bias     (192)
BR_WO = BR_QKV + ATT_LAYERS             # per att layer out-proj bias      (64)
BR_CGC = BR_WO + ATT_LAYERS             # per CGC layer fused bias         (206/106)
BR_TOWER = BR_CGC + LAYER_NUM           # fused tower bias                 (24)
BR_OUT1 = BR_TOWER + 1                  # fused output-layer-1 bias        (26)
BR_OUT2 = BR_OUT1 + 1                   # fused output-layer-2 bias        (19)
BR_SCAL = BR_OUT2 + 1                   # [FeaturesLinear bias, att_fc bias] (2)
BIAS_ROWS = BR_SCAL + 1

N_OUT1 = 8 + TIME_DIM + TIME_DIM        # binary-hidden(8) | reg(9) | united(9)
N_OUT2 = 1 + TIME_DIM + TIME_DIM        # binary(1) | reg(9) | united(9)


def _vmem():
    return pl.BlockSpec(memory_space=pltpu.MemorySpace.VMEM)


# ------------------------------ fused kernel --------------------------------
def _mtc_kernel(idx_ref, table_ref, w_er_ref, w_qkv_ref, w_o_ref, wfc_ref,
                w_cgc0_ref, w_cgc1_ref, w_tow_ref, w_out1_ref, w_out2_ref,
                bias_ref, o_ref, *, batch):
    f32 = jnp.float32
    B = batch
    F = NUM_FIELDS
    E = EMBED_DIM
    BF = B * F

    def brow(r, w):                       # one bias row from the bias slab
        return bias_ref[r:r + 1, :w]

    def iota(shape, dim):
        return jax.lax.broadcasted_iota(jnp.int32, shape, dim)

    def softmax(z):
        z = z - jnp.max(z, axis=-1, keepdims=True)
        e = jnp.exp(z)
        return e / jnp.sum(e, axis=-1, keepdims=True)

    # ---- 1. embedding gather: one-hot (BF, TOTAL) @ packed table ----------
    onehot = (iota((BF, TOTAL_FEATS), 1) == idx_ref[...]).astype(f32)
    rows = jnp.dot(onehot, table_ref[...], preferred_element_type=f32)  # (BF, E+1)
    embed2d = rows[:, :E]                 # (BF, E)   per (batch, field) embedding
    rowlin = rows[:, E:E + 1]             # (BF, 1)   FeaturesLinear weights

    # experts-input precursor: tile embeddings along lanes, keep only the lane
    # block matching each row's field; the segment-sum matmul below turns this
    # into the (B, F*E) experts_input with no in-kernel reshape.
    fmask = ((iota((BF, F * E), 0) & (F - 1)) ==
             (iota((BF, F * E), 1) >> LOG2_E)).astype(f32)
    embed_wide = jnp.concatenate([embed2d] * F, axis=1) * fmask         # (BF, F*E)

    # ---- 2. AutoInt (fused att_embed | residual projection) ---------------
    curres = (jnp.dot(embed2d, w_er_ref[...], preferred_element_type=f32)
              + brow(BR_ER, 2 * ATT_DIM))
    cur, res = curres[:, :ATT_DIM], curres[:, ATT_DIM:]

    dh = ATT_DIM // ATT_HEADS
    scale = 1.0 / float(dh) ** 0.5
    # per-batch (block-diagonal) attention over the fields
    attn_bias = jnp.where((iota((BF, BF), 0) >> LOG2_F) ==
                          (iota((BF, BF), 1) >> LOG2_F), 0.0, -1e30).astype(f32)

    for l in range(ATT_LAYERS):
        wqkv = w_qkv_ref[l * ATT_DIM:(l + 1) * ATT_DIM, :]
        wo = w_o_ref[l * ATT_DIM:(l + 1) * ATT_DIM, :]
        qkv = (jnp.dot(cur, wqkv, preferred_element_type=f32)
               + brow(BR_QKV + l, 3 * ATT_DIM))
        heads = []
        for h in range(ATT_HEADS):
            q = qkv[:, h * dh:(h + 1) * dh] * scale
            k = qkv[:, ATT_DIM + h * dh:ATT_DIM + (h + 1) * dh]
            v = qkv[:, 2 * ATT_DIM + h * dh:2 * ATT_DIM + (h + 1) * dh]
            s = jax.lax.dot_general(q, k, (((1,), (1,)), ((), ())),
                                    preferred_element_type=f32) + attn_bias
            heads.append(jnp.dot(softmax(s), v, preferred_element_type=f32))
        ctx = jnp.concatenate(heads, axis=1)                            # (BF, ATT)
        out = (jnp.dot(ctx, wo, preferred_element_type=f32)
               + brow(BR_WO + l, ATT_DIM))
        cur = jnp.maximum(out + res, 0.0) if l == ATT_LAYERS - 1 else out

    # att_fc: each row contracts against its own field's slice of the fc weight
    m = jax.lax.dot_general(cur, wfc_ref[...], (((1,), (1,)), ((), ())),
                            preferred_element_type=f32)                 # (BF, F)
    fsel = (iota((BF, F), 0) & (F - 1)) == iota((BF, F), 1)
    att_rowsum = jnp.sum(jnp.where(fsel, m, 0.0), axis=-1, keepdims=True)

    # ---- 3. single segment-sum matmul: per-row -> per-batch ---------------
    seg = ((iota((B, BF), 1) >> LOG2_F) == iota((B, BF), 0)).astype(f32)
    wide = jnp.concatenate([embed_wide, rowlin, att_rowsum], axis=1)    # (BF, F*E+2)
    batched = jnp.dot(seg, wide, preferred_element_type=f32)            # (B, F*E+2)
    experts_in = batched[:, :F * E]
    lin_att = batched[:, F * E:F * E + 2] + brow(BR_SCAL, 2)            # [lin, att]

    # ---- 4. CGC / MTC layers: one block-diagonal matmul per layer ---------
    f0 = f1 = fs = experts_in
    cgc_w = (w_cgc0_ref, w_cgc1_ref)
    ng = NUM_SPECIFIC + NUM_SHARED
    for i in range(LAYER_NUM):
        d_out = EXPERTS_DIMS[i][-1]
        last = i == LAYER_NUM - 1
        n_gs = NUM_SHARED if last else NUM_SHARED + TASK_NUM * NUM_SPECIFIC
        eo = NUM_SPECIFIC * d_out
        so = NUM_SHARED * d_out
        n_cols = TASK_NUM * eo + so + TASK_NUM * ng + n_gs
        xcat = jnp.concatenate([f0, f1, fs], axis=1)                    # (B, 3*d_in)
        z = (jnp.dot(xcat, cgc_w[i][...], preferred_element_type=f32)
             + brow(BR_CGC + i, n_cols))
        t0 = jnp.maximum(z[:, :eo], 0.0)
        t1 = jnp.maximum(z[:, eo:2 * eo], 0.0)
        sh = jnp.maximum(z[:, 2 * eo:2 * eo + so], 0.0)
        go = 2 * eo + so
        g0 = softmax(z[:, go:go + ng])
        g1 = softmax(z[:, go + ng:go + 2 * ng])
        gs = softmax(z[:, go + 2 * ng:go + 2 * ng + n_gs])
        t0_e = [t0[:, e * d_out:(e + 1) * d_out] for e in range(NUM_SPECIFIC)]
        t1_e = [t1[:, e * d_out:(e + 1) * d_out] for e in range(NUM_SPECIFIC)]
        sh_e = [sh[:, e * d_out:(e + 1) * d_out] for e in range(NUM_SHARED)]

        def mix(gate, experts):
            acc = gate[:, 0:1] * experts[0]
            for e in range(1, len(experts)):
                acc = acc + gate[:, e:e + 1] * experts[e]
            return acc

        f0 = mix(g0, t0_e + sh_e)                        # order: specific, shared
        f1 = mix(g1, t1_e + sh_e)
        fs = mix(gs, sh_e if last else (t0_e + t1_e + sh_e))

    # ---- 5. towers + output heads (block-diagonal folded) -----------------
    td0 = TOWER_DIMS[0][-1]
    tdu = TOWER_DIMS[1][-1]
    xt = jnp.concatenate([f0, f1, fs], axis=1)                          # (B, 48)
    tw = jnp.maximum(jnp.dot(xt, w_tow_ref[...], preferred_element_type=f32)
                     + brow(BR_TOWER, 2 * td0 + tdu), 0.0)
    tow0 = tw[:, :td0]
    tow1 = tw[:, td0:2 * td0]
    utow = tw[:, 2 * td0:2 * td0 + tdu]
    # x0 = [lin, att, tow0], x1 = [lin, att, tow1], plus united tower input
    xo = jnp.concatenate([lin_att, tow0, lin_att, tow1, utow], axis=1)  # (B, 28)
    z1 = jnp.dot(xo, w_out1_ref[...], preferred_element_type=f32) + brow(BR_OUT1, N_OUT1)
    z2 = jnp.dot(z1, w_out2_ref[...], preferred_element_type=f32) + brow(BR_OUT2, N_OUT2)
    r0 = 1.0 / (1.0 + jnp.exp(-z2[:, 0:1]))              # binary task (sigmoid)
    r1 = z2[:, 1:1 + TIME_DIM]                           # regression task
    ru = z2[:, 1 + TIME_DIM:1 + 2 * TIME_DIM]            # united head
    o_ref[...] = jnp.concatenate([r0, r1, r1 - ru], axis=1).astype(o_ref.dtype)


# -------------------------- parameter construction --------------------------
class ParamGen:
    def __init__(self, seed=0):
        self._key = jax.random.PRNGKey(seed)

    def _next(self):
        self._key, sub = jax.random.split(self._key)
        return sub

    def normal(self, shape, scale=0.05):
        return scale * jax.random.normal(self._next(), shape, jnp.float32)

    def uniform(self, shape, lo, hi):
        return jax.random.uniform(self._next(), shape, jnp.float32, lo, hi)


def make_linear(gen, din, dout):
    return {"w": gen.normal((din, dout)), "b": gen.normal((dout,), 0.01)}


def make_mlp(gen, din, dims):
    """Linear -> BatchNorm1d(eval, folded into Linear) -> ReLU (-> Dropout==id)."""
    layers = []
    d = din
    for dout in dims:
        w = gen.normal((d, dout))
        b = gen.normal((dout,), 0.01)
        gamma = 1.0 + gen.normal((dout,), 0.1)
        beta = gen.normal((dout,), 0.05)
        mean = gen.normal((dout,), 0.05)
        var = gen.uniform((dout,), 0.8, 1.2)
        s = gamma / jnp.sqrt(var + BN_EPS)
        layers.append({"w": w * s[None, :], "b": (b - mean) * s + beta})
        d = dout
    return layers


def make_params(gen):
    p = {}
    p["emb_table"] = gen.normal((TOTAL_FEATS, EMBED_DIM), 0.1)
    p["lin_w"] = gen.normal((TOTAL_FEATS, 1), 0.1)
    p["lin_b"] = gen.normal((1,), 0.01)
    p["att_embed"] = make_linear(gen, EMBED_DIM, ATT_DIM)
    p["att_res"] = make_linear(gen, EMBED_DIM, ATT_DIM)
    p["att_layers"] = [
        {k: make_linear(gen, ATT_DIM, ATT_DIM) for k in ("q", "k", "v", "o")}
        for _ in range(ATT_LAYERS)
    ]
    p["att_fc"] = make_linear(gen, NUM_FIELDS * ATT_DIM, 1)
    p["shared_experts"], p["shared_gates"] = [], []
    p["task_experts"], p["task_gates"] = [], []
    for i in range(LAYER_NUM):
        in_dim = EMBED_OUT if i == 0 else EXPERTS_DIMS[i - 1][-1]
        p["shared_experts"].append(
            [make_mlp(gen, in_dim, EXPERTS_DIMS[i]) for _ in range(NUM_SHARED)])
        if i != LAYER_NUM - 1:
            p["shared_gates"].append(
                make_linear(gen, in_dim, NUM_SHARED + TASK_NUM * NUM_SPECIFIC))
        else:
            p["shared_gates"].append(make_linear(gen, in_dim, NUM_SHARED))
        p["task_experts"].append(
            [[make_mlp(gen, in_dim, EXPERTS_DIMS[i]) for _ in range(NUM_SPECIFIC)]
             for _ in range(TASK_NUM)])
        p["task_gates"].append(
            [make_linear(gen, in_dim, NUM_SHARED + NUM_SPECIFIC)
             for _ in range(TASK_NUM)])
    p["towers"] = [make_mlp(gen, EXPERTS_DIMS[-1][-1], TOWER_DIMS[0])
                   for _ in range(TASK_NUM)]
    p["united_tower"] = make_mlp(gen, EXPERTS_DIMS[-1][-1], TOWER_DIMS[1])
    p["output_layers"] = []
    for t in TASK_TYPES:
        if t == "binary":
            p["output_layers"].append(
                [make_linear(gen, 2 + TOWER_DIMS[0][-1], 8), make_linear(gen, 8, 1)])
        else:
            p["output_layers"].append(
                [make_linear(gen, 2 + TOWER_DIMS[0][-1], TIME_DIM),
                 make_linear(gen, TIME_DIM, TIME_DIM)])
    p["united_out"] = [make_linear(gen, TOWER_DIMS[1][-1], TIME_DIM),
                       make_linear(gen, TIME_DIM, TIME_DIM)]
    return p


def pack_params(p):
    """Fold / block-diagonalize all parameters once, outside the hot path."""
    def bd(blocks):                                   # block-diagonal stack
        rs = sum(b.shape[0] for b in blocks)
        cs = sum(b.shape[1] for b in blocks)
        out = jnp.zeros((rs, cs), jnp.float32)
        r = c = 0
        for b in blocks:
            out = out.at[r:r + b.shape[0], c:c + b.shape[1]].set(b)
            r += b.shape[0]
            c += b.shape[1]
        return out

    def brow(parts):                                  # one padded bias-slab row
        v = jnp.concatenate([jnp.asarray(x, jnp.float32).reshape(-1) for x in parts])
        assert v.shape[0] <= BIAS_W
        return jnp.pad(v, (0, BIAS_W - v.shape[0]))[None, :]

    pk = {}
    # packed [embedding | FeaturesLinear weight] table, 2-D (one (40,128) tile)
    pk["table"] = jnp.concatenate([p["emb_table"], p["lin_w"]], axis=1)   # (36, 9)
    # fused att_embed | residual projection
    pk["w_er"] = jnp.concatenate([p["att_embed"]["w"], p["att_res"]["w"]], axis=1)
    # stacked per-layer fused QKV and output projections
    pk["w_qkv"] = jnp.concatenate(
        [jnp.concatenate([lp["q"]["w"], lp["k"]["w"], lp["v"]["w"]], axis=1)
         for lp in p["att_layers"]], axis=0)                              # (192, 192)
    pk["w_o"] = jnp.concatenate([lp["o"]["w"] for lp in p["att_layers"]], axis=0)
    pk["wfc"] = p["att_fc"]["w"].reshape(NUM_FIELDS, ATT_DIM)             # (4, 64)

    bias_rows = [brow([p["att_embed"]["b"], p["att_res"]["b"]])]          # BR_ER
    bias_rows += [brow([lp["q"]["b"], lp["k"]["b"], lp["v"]["b"]])
                  for lp in p["att_layers"]]                              # BR_QKV..
    bias_rows += [brow([lp["o"]["b"]]) for lp in p["att_layers"]]         # BR_WO..

    pk["w_cgc"] = []
    for i in range(LAYER_NUM):
        assert len(EXPERTS_DIMS[i]) == 1, "stacked-expert folding assumes 1-layer experts"
        t_w = [jnp.concatenate([e[0]["w"] for e in p["task_experts"][i][j]], axis=1)
               for j in range(TASK_NUM)]
        t_b = [jnp.concatenate([e[0]["b"] for e in p["task_experts"][i][j]])
               for j in range(TASK_NUM)]
        sh_w = jnp.concatenate([e[0]["w"] for e in p["shared_experts"][i]], axis=1)
        sh_b = jnp.concatenate([e[0]["b"] for e in p["shared_experts"][i]])
        g_w = [p["task_gates"][i][j]["w"] for j in range(TASK_NUM)]
        g_b = [p["task_gates"][i][j]["b"] for j in range(TASK_NUM)]
        gs_w = p["shared_gates"][i]["w"]
        gs_b = p["shared_gates"][i]["b"]
        # rows: [f0 | f1 | fs]; cols: [t0 experts | t1 experts | shared | g0 | g1 | gs]
        pk["w_cgc"].append(
            jnp.concatenate([bd(t_w + [sh_w]), bd(g_w + [gs_w])], axis=1))
        bias_rows.append(brow(t_b + [sh_b] + g_b + [gs_b]))               # BR_CGC+i

    assert len(TOWER_DIMS[0]) == 1 and len(TOWER_DIMS[1]) == 1
    pk["w_tow"] = bd([p["towers"][0][0]["w"], p["towers"][1][0]["w"],
                      p["united_tower"][0]["w"]])                         # (48, 24)
    bias_rows.append(brow([p["towers"][0][0]["b"], p["towers"][1][0]["b"],
                           p["united_tower"][0]["b"]]))                   # BR_TOWER
    (o0l1, o0l2), (o1l1, o1l2) = p["output_layers"]
    u1, u2 = p["united_out"]
    pk["w_out1"] = bd([o0l1["w"], o1l1["w"], u1["w"]])                    # (28, 26)
    pk["w_out2"] = bd([o0l2["w"], o1l2["w"], u2["w"]])                    # (26, 19)
    bias_rows.append(brow([o0l1["b"], o1l1["b"], u1["b"]]))               # BR_OUT1
    bias_rows.append(brow([o0l2["b"], o1l2["b"], u2["b"]]))               # BR_OUT2
    bias_rows.append(brow([p["lin_b"], p["att_fc"]["b"]]))                # BR_SCAL
    pk["bias"] = jnp.concatenate(bias_rows, axis=0)                       # (13, 256)
    assert pk["bias"].shape[0] == BIAS_ROWS
    return pk


# --------------------------------- forward ----------------------------------
def mtc_forward(packed, x_idx):
    B, F = x_idx.shape
    offs, s = [], 0
    for d in FEATURE_DIMS:
        offs.append(s)
        s += d
    idx = (x_idx.astype(jnp.int32)
           + jnp.asarray(offs, jnp.int32)[None, :]).reshape(B * F, 1)

    out = pl.pallas_call(
        functools.partial(_mtc_kernel, batch=B),
        out_shape=jax.ShapeDtypeStruct((B, 1 + 2 * TIME_DIM), jnp.float32),
        in_specs=[_vmem()] * 12,
        out_specs=_vmem(),
    )(idx, packed["table"], packed["w_er"], packed["w_qkv"], packed["w_o"],
      packed["wfc"], packed["w_cgc"][0], packed["w_cgc"][1],
      packed["w_tow"], packed["w_out1"], packed["w_out2"], packed["bias"])

    r0 = out[:, 0]                                # binary task (sigmoid), (B,)
    r1 = out[:, 1:1 + TIME_DIM]                   # regression task, (B, TIME_DIM)
    final = out[:, 1 + TIME_DIM:]                 # regression - united, (B, TIME_DIM)
    return [r0, r1, final]


# ----------------------------------- main ------------------------------------
if __name__ == "__main__":
    gen = ParamGen(seed=0)
    params = make_params(gen)
    packed = pack_params(params)

    key = jax.random.PRNGKey(0)
    B = 2
    cols = []
    for d in FEATURE_DIMS:
        key, sub = jax.random.split(key)
        cols.append(jax.random.randint(sub, (B, 1), 0, d, dtype=jnp.int32))
    x_idx = jnp.concatenate(cols, axis=1)          # (B, num_fields) int32

    outs = jax.jit(mtc_forward)(packed, x_idx)
    outs = jax.block_until_ready(outs)

    assert outs[0].shape == (B,)                   # binary task (sigmoid)
    assert outs[1].shape == (B, TIME_DIM)          # regression task
    assert outs[2].shape == (B, TIME_DIM)          # regression - united
    assert all(bool(jnp.all(jnp.isfinite(o))) for o in outs)
    assert bool(jnp.all((outs[0] > 0.0) & (outs[0] < 1.0)))
    print("KERNEL_OK")
</pallas_src>

<mosaic_0001>
module attributes {stable_mosaic.version = 11 : i64} {
  func.func @_mtc_kernel(%arg0: memref<8x1xi32, #tpu.memory_space<vmem>>, %arg1: memref<36x9xf32, #tpu.memory_space<vmem>>, %arg2: memref<8x128xf32, #tpu.memory_space<vmem>>, %arg3: memref<192x192xf32, #tpu.memory_space<vmem>>, %arg4: memref<192x64xf32, #tpu.memory_space<vmem>>, %arg5: memref<4x64xf32, #tpu.memory_space<vmem>>, %arg6: memref<96x206xf32, #tpu.memory_space<vmem>>, %arg7: memref<96x106xf32, #tpu.memory_space<vmem>>, %arg8: memref<48x24xf32, #tpu.memory_space<vmem>>, %arg9: memref<28x26xf32, #tpu.memory_space<vmem>>, %arg10: memref<26x19xf32, #tpu.memory_space<vmem>>, %arg11: memref<13x256xf32, #tpu.memory_space<vmem>>, %arg12: memref<2x19xf32, #tpu.memory_space<vmem>>) attributes {dimension_semantics = [], scalar_prefetch = 0 : i64, scratch_operands = 0 : i64, tpu.core_type = #tpu.core_type<tc>} {
    %0 = tpu.iota {dimensions = array<i32: 1>} : vector<8x36xi32>
    %c0 = arith.constant 0 : index
    %c0_0 = arith.constant 0 : index
    %1 = vector.load %arg0[%c0, %c0_0] : memref<8x1xi32, #tpu.memory_space<vmem>>, vector<8x1xi32>
    %2 = vector.broadcast %1 : vector<8x1xi32> to vector<8x36xi32>
    %3 = arith.cmpi eq, %0, %2 : vector<8x36xi32>
    %4 = arith.extui %3 : vector<8x36xi1> to vector<8x36xi32>
    %5 = arith.sitofp %4 : vector<8x36xi32> to vector<8x36xf32>
    %c0_1 = arith.constant 0 : index
    %c0_2 = arith.constant 0 : index
    %6 = vector.load %arg1[%c0_1, %c0_2] : memref<36x9xf32, #tpu.memory_space<vmem>>, vector<36x9xf32>
    %cst = arith.constant dense<0.000000e+00> : vector<8x9xf32>
    %7 = tpu.matmul %5, %6, %cst {dimension_numbers = #tpu.dot_dimension_numbers<[1], [0], [0], [1], [0, 0, 1, 1], [], []>} : vector<8x36xf32>, vector<36x9xf32>, vector<8x9xf32> -> vector<8x9xf32>
    %8 = vector.extract_strided_slice %7 {offsets = [0, 0], sizes = [8, 8], strides = [1, 1]} : vector<8x9xf32> to vector<8x8xf32>
    %9 = vector.extract_strided_slice %7 {offsets = [0, 8], sizes = [8, 1], strides = [1, 1]} : vector<8x9xf32> to vector<8x1xf32>
    %10 = tpu.iota {dimensions = array<i32: 0>} : vector<8x32xi32>
    %c3_i32 = arith.constant 3 : i32
    %11 = vector.broadcast %c3_i32 : i32 to vector<8x32xi32>
    %12 = arith.andi %10, %11 : vector<8x32xi32>
    %13 = tpu.iota {dimensions = array<i32: 1>} : vector<8x32xi32>
    %c3_i32_3 = arith.constant 3 : i32
    %14 = vector.broadcast %c3_i32_3 : i32 to vector<8x32xi32>
    %15 = arith.shrsi %13, %14 : vector<8x32xi32>
    %16 = arith.cmpi eq, %12, %15 : vector<8x32xi32>
    %17 = arith.extui %16 : vector<8x32xi1> to vector<8x32xi32>
    %18 = arith.sitofp %17 : vector<8x32xi32> to vector<8x32xf32>
    %19 = tpu.concatenate %8, %8, %8, %8 in 1 : vector<8x8xf32>, vector<8x8xf32>, vector<8x8xf32>, vector<8x8xf32> -> vector<8x32xf32>
    %20 = arith.mulf %19, %18 : vector<8x32xf32>
    %c0_4 = arith.constant 0 : index
    %c0_5 = arith.constant 0 : index
    %21 = vector.load %arg2[%c0_4, %c0_5] : memref<8x128xf32, #tpu.memory_space<vmem>>, vector<8x128xf32>
    %cst_6 = arith.constant dense<0.000000e+00> : vector<8x128xf32>
    %22 = tpu.matmul %8, %21, %cst_6 {dimension_numbers = #tpu.dot_dimension_numbers<[1], [0], [0], [1], [0, 0, 1, 1], [], []>} : vector<8x8xf32>, vector<8x128xf32>, vector<8x128xf32> -> vector<8x128xf32>
    %c0_7 = arith.constant 0 : index
    %c0_8 = arith.constant 0 : index
    %23 = vector.load %arg11[%c0_7, %c0_8] : memref<13x256xf32, #tpu.memory_space<vmem>>, vector<1x128xf32>
    %24 = vector.broadcast %23 : vector<1x128xf32> to vector<8x128xf32>
    %25 = arith.addf %22, %24 : vector<8x128xf32>
    %26 = vector.extract_strided_slice %25 {offsets = [0, 0], sizes = [8, 64], strides = [1, 1]} : vector<8x128xf32> to vector<8x64xf32>
    %27 = vector.extract_strided_slice %25 {offsets = [0, 64], sizes = [8, 64], strides = [1, 1]} : vector<8x128xf32> to vector<8x64xf32>
    %28 = tpu.iota {dimensions = array<i32: 0>} : vector<8x8xi32>
    %c2_i32 = arith.constant 2 : i32
    %29 = vector.broadcast %c2_i32 : i32 to vector<8x8xi32>
    %30 = arith.shrsi %28, %29 : vector<8x8xi32>
    %31 = tpu.iota {dimensions = array<i32: 1>} : vector<8x8xi32>
    %c2_i32_9 = arith.constant 2 : i32
    %32 = vector.broadcast %c2_i32_9 : i32 to vector<8x8xi32>
    %33 = arith.shrsi %31, %32 : vector<8x8xi32>
    %34 = arith.cmpi eq, %30, %33 : vector<8x8xi32>
    %cst_10 = arith.constant 0.000000e+00 : f32
    %cst_11 = arith.constant -1.000000e+30 : f32
    %35 = vector.broadcast %cst_10 : f32 to vector<8x8xf32>
    %36 = vector.broadcast %cst_11 : f32 to vector<8x8xf32>
    %37 = arith.select %34, %35, %36 : vector<8x8xi1>, vector<8x8xf32>
    %c0_12 = arith.constant 0 : index
    %c0_13 = arith.constant 0 : index
    %38 = vector.load %arg3[%c0_12, %c0_13] : memref<192x192xf32, #tpu.memory_space<vmem>>, vector<64x192xf32>
    %c0_14 = arith.constant 0 : index
    %c0_15 = arith.constant 0 : index
    %39 = vector.load %arg4[%c0_14, %c0_15] : memref<192x64xf32, #tpu.memory_space<vmem>>, vector<64x64xf32>
    %cst_16 = arith.constant dense<0.000000e+00> : vector<8x192xf32>
    %40 = tpu.matmul %26, %38, %cst_16 {dimension_numbers = #tpu.dot_dimension_numbers<[1], [0], [0], [1], [0, 0, 1, 1], [], []>} : vector<8x64xf32>, vector<64x192xf32>, vector<8x192xf32> -> vector<8x192xf32>
    %c1 = arith.constant 1 : index
    %c0_17 = arith.constant 0 : index
    %41 = vector.load %arg11[%c1, %c0_17] : memref<13x256xf32, #tpu.memory_space<vmem>>, vector<1x192xf32>
    %42 = vector.broadcast %41 : vector<1x192xf32> to vector<8x192xf32>
    %43 = arith.addf %40, %42 : vector<8x192xf32>
    %44 = vector.extract_strided_slice %43 {offsets = [0, 0], sizes = [8, 32], strides = [1, 1]} : vector<8x192xf32> to vector<8x32xf32>
    %cst_18 = arith.constant 0.176776692 : f32
    %45 = vector.broadcast %cst_18 : f32 to vector<8x32xf32>
    %46 = arith.mulf %44, %45 : vector<8x32xf32>
    %47 = vector.extract_strided_slice %43 {offsets = [0, 64], sizes = [8, 32], strides = [1, 1]} : vector<8x192xf32> to vector<8x32xf32>
    %48 = vector.extract_strided_slice %43 {offsets = [0, 128], sizes = [8, 32], strides = [1, 1]} : vector<8x192xf32> to vector<8x32xf32>
    %cst_19 = arith.constant dense<0.000000e+00> : vector<8x8xf32>
    %49 = tpu.matmul %46, %47, %cst_19 {dimension_numbers = #tpu.dot_dimension_numbers<[1], [1], [0], [0], [0, 0, 1, 0], [], []>} : vector<8x32xf32>, vector<8x32xf32>, vector<8x8xf32> -> vector<8x8xf32>
    %50 = arith.addf %49, %37 : vector<8x8xf32>
    %cst_20 = arith.constant dense<0xFF800000> : vector<8xf32>
    %51 = vector.multi_reduction <maximumf>, %50, %cst_20 [1] : vector<8x8xf32> to vector<8xf32>
    %52 = vector.shape_cast %51 : vector<8xf32> to vector<8x1xf32>
    %53 = vector.broadcast %52 : vector<8x1xf32> to vector<8x8xf32>
    %54 = arith.subf %50, %53 : vector<8x8xf32>
    %55 = math.exp %54 : vector<8x8xf32>
    %cst_21 = arith.constant dense<0.000000e+00> : vector<8xf32>
    %56 = vector.multi_reduction <add>, %55, %cst_21 [1] : vector<8x8xf32> to vector<8xf32>
    %57 = vector.shape_cast %56 : vector<8xf32> to vector<8x1xf32>
    %58 = vector.broadcast %57 : vector<8x1xf32> to vector<8x8xf32>
    %59 = arith.divf %55, %58 : vector<8x8xf32>
    %cst_22 = arith.constant dense<0.000000e+00> : vector<8x32xf32>
    %60 = tpu.matmul %59, %48, %cst_22 {dimension_numbers = #tpu.dot_dimension_numbers<[1], [0], [0], [1], [0, 0, 1, 1], [], []>} : vector<8x8xf32>, vector<8x32xf32>, vector<8x32xf32> -> vector<8x32xf32>
    %61 = vector.extract_strided_slice %43 {offsets = [0, 32], sizes = [8, 32], strides = [1, 1]} : vector<8x192xf32> to vector<8x32xf32>
    %cst_23 = arith.constant 0.176776692 : f32
    %62 = vector.broadcast %cst_23 : f32 to vector<8x32xf32>
    %63 = arith.mulf %61, %62 : vector<8x32xf32>
    %64 = vector.extract_strided_slice %43 {offsets = [0, 96], sizes = [8, 32], strides = [1, 1]} : vector<8x192xf32> to vector<8x32xf32>
    %65 = vector.extract_strided_slice %43 {offsets = [0, 160], sizes = [8, 32], strides = [1, 1]} : vector<8x192xf32> to vector<8x32xf32>
    %cst_24 = arith.constant dense<0.000000e+00> : vector<8x8xf32>
    %66 = tpu.matmul %63, %64, %cst_24 {dimension_numbers = #tpu.dot_dimension_numbers<[1], [1], [0], [0], [0, 0, 1, 0], [], []>} : vector<8x32xf32>, vector<8x32xf32>, vector<8x8xf32> -> vector<8x8xf32>
    %67 = arith.addf %66, %37 : vector<8x8xf32>
    %cst_25 = arith.constant dense<0xFF800000> : vector<8xf32>
    %68 = vector.multi_reduction <maximumf>, %67, %cst_25 [1] : vector<8x8xf32> to vector<8xf32>
    %69 = vector.shape_cast %68 : vector<8xf32> to vector<8x1xf32>
    %70 = vector.broadcast %69 : vector<8x1xf32> to vector<8x8xf32>
    %71 = arith.subf %67, %70 : vector<8x8xf32>
    %72 = math.exp %71 : vector<8x8xf32>
    %cst_26 = arith.constant dense<0.000000e+00> : vector<8xf32>
    %73 = vector.multi_reduction <add>, %72, %cst_26 [1] : vector<8x8xf32> to vector<8xf32>
    %74 = vector.shape_cast %73 : vector<8xf32> to vector<8x1xf32>
    %75 = vector.broadcast %74 : vector<8x1xf32> to vector<8x8xf32>
    %76 = arith.divf %72, %75 : vector<8x8xf32>
    %cst_27 = arith.constant dense<0.000000e+00> : vector<8x32xf32>
    %77 = tpu.matmul %76, %65, %cst_27 {dimension_numbers = #tpu.dot_dimension_numbers<[1], [0], [0], [1], [0, 0, 1, 1], [], []>} : vector<8x8xf32>, vector<8x32xf32>, vector<8x32xf32> -> vector<8x32xf32>
    %78 = tpu.concatenate %60, %77 in 1 : vector<8x32xf32>, vector<8x32xf32> -> vector<8x64xf32>
    %cst_28 = arith.constant dense<0.000000e+00> : vector<8x64xf32>
    %79 = tpu.matmul %78, %39, %cst_28 {dimension_numbers = #tpu.dot_dimension_numbers<[1], [0], [0], [1], [0, 0, 1, 1], [], []>} : vector<8x64xf32>, vector<64x64xf32>, vector<8x64xf32> -> vector<8x64xf32>
    %c4 = arith.constant 4 : index
    %c0_29 = arith.constant 0 : index
    %80 = vector.load %arg11[%c4, %c0_29] : memref<13x256xf32, #tpu.memory_space<vmem>>, vector<1x64xf32>
    %81 = vector.broadcast %80 : vector<1x64xf32> to vector<8x64xf32>
    %82 = arith.addf %79, %81 : vector<8x64xf32>
    %c64 = arith.constant 64 : index
    %c0_30 = arith.constant 0 : index
    %83 = vector.load %arg3[%c64, %c0_30] : memref<192x192xf32, #tpu.memory_space<vmem>>, vector<64x192xf32>
    %c64_31 = arith.constant 64 : index
    %c0_32 = arith.constant 0 : index
    %84 = vector.load %arg4[%c64_31, %c0_32] : memref<192x64xf32, #tpu.memory_space<vmem>>, vector<64x64xf32>
    %cst_33 = arith.constant dense<0.000000e+00> : vector<8x192xf32>
    %85 = tpu.matmul %82, %83, %cst_33 {dimension_numbers = #tpu.dot_dimension_numbers<[1], [0], [0], [1], [0, 0, 1, 1], [], []>} : vector<8x64xf32>, vector<64x192xf32>, vector<8x192xf32> -> vector<8x192xf32>
    %c2 = arith.constant 2 : index
    %c0_34 = arith.constant 0 : index
    %86 = vector.load %arg11[%c2, %c0_34] : memref<13x256xf32, #tpu.memory_space<vmem>>, vector<1x192xf32>
    %87 = vector.broadcast %86 : vector<1x192xf32> to vector<8x192xf32>
    %88 = arith.addf %85, %87 : vector<8x192xf32>
    %89 = vector.extract_strided_slice %88 {offsets = [0, 0], sizes = [8, 32], strides = [1, 1]} : vector<8x192xf32> to vector<8x32xf32>
    %cst_35 = arith.constant 0.176776692 : f32
    %90 = vector.broadcast %cst_35 : f32 to vector<8x32xf32>
    %91 = arith.mulf %89, %90 : vector<8x32xf32>
    %92 = vector.extract_strided_slice %88 {offsets = [0, 64], sizes = [8, 32], strides = [1, 1]} : vector<8x192xf32> to vector<8x32xf32>
    %93 = vector.extract_strided_slice %88 {offsets = [0, 128], sizes = [8, 32], strides = [1, 1]} : vector<8x192xf32> to vector<8x32xf32>
    %cst_36 = arith.constant dense<0.000000e+00> : vector<8x8xf32>
    %94 = tpu.matmul %91, %92, %cst_36 {dimension_numbers = #tpu.dot_dimension_numbers<[1], [1], [0], [0], [0, 0, 1, 0], [], []>} : vector<8x32xf32>, vector<8x32xf32>, vector<8x8xf32> -> vector<8x8xf32>
    %95 = arith.addf %94, %37 : vector<8x8xf32>
    %cst_37 = arith.constant dense<0xFF800000> : vector<8xf32>
    %96 = vector.multi_reduction <maximumf>, %95, %cst_37 [1] : vector<8x8xf32> to vector<8xf32>
    %97 = vector.shape_cast %96 : vector<8xf32> to vector<8x1xf32>
    %98 = vector.broadcast %97 : vector<8x1xf32> to vector<8x8xf32>
    %99 = arith.subf %95, %98 : vector<8x8xf32>
    %100 = math.exp %99 : vector<8x8xf32>
    %cst_38 = arith.constant dense<0.000000e+00> : vector<8xf32>
    %101 = vector.multi_reduction <add>, %100, %cst_38 [1] : vector<8x8xf32> to vector<8xf32>
    %102 = vector.shape_cast %101 : vector<8xf32> to vector<8x1xf32>
    %103 = vector.broadcast %102 : vector<8x1xf32> to vector<8x8xf32>
    %104 = arith.divf %100, %103 : vector<8x8xf32>
    %cst_39 = arith.constant dense<0.000000e+00> : vector<8x32xf32>
    %105 = tpu.matmul %104, %93, %cst_39 {dimension_numbers = #tpu.dot_dimension_numbers<[1], [0], [0], [1], [0, 0, 1, 1], [], []>} : vector<8x8xf32>, vector<8x32xf32>, vector<8x32xf32> -> vector<8x32xf32>
    %106 = vector.extract_strided_slice %88 {offsets = [0, 32], sizes = [8, 32], strides = [1, 1]} : vector<8x192xf32> to vector<8x32xf32>
    %cst_40 = arith.constant 0.176776692 : f32
    %107 = vector.broadcast %cst_40 : f32 to vector<8x32xf32>
    %108 = arith.mulf %106, %107 : vector<8x32xf32>
    %109 = vector.extract_strided_slice %88 {offsets = [0, 96], sizes = [8, 32], strides = [1, 1]} : vector<8x192xf32> to vector<8x32xf32>
    %110 = vector.extract_strided_slice %88 {offsets = [0, 160], sizes = [8, 32], strides = [1, 1]} : vector<8x192xf32> to vector<8x32xf32>
    %cst_41 = arith.constant dense<0.000000e+00> : vector<8x8xf32>
    %111 = tpu.matmul %108, %109, %cst_41 {dimension_numbers = #tpu.dot_dimension_numbers<[1], [1], [0], [0], [0, 0, 1, 0], [], []>} : vector<8x32xf32>, vector<8x32xf32>, vector<8x8xf32> -> vector<8x8xf32>
    %112 = arith.addf %111, %37 : vector<8x8xf32>
    %cst_42 = arith.constant dense<0xFF800000> : vector<8xf32>
    %113 = vector.multi_reduction <maximumf>, %112, %cst_42 [1] : vector<8x8xf32> to vector<8xf32>
    %114 = vector.shape_cast %113 : vector<8xf32> to vector<8x1xf32>
    %115 = vector.broadcast %114 : vector<8x1xf32> to vector<8x8xf32>
    %116 = arith.subf %112, %115 : vector<8x8xf32>
    %117 = math.exp %116 : vector<8x8xf32>
    %cst_43 = arith.constant dense<0.000000e+00> : vector<8xf32>
    %118 = vector.multi_reduction <add>, %117, %cst_43 [1] : vector<8x8xf32> to vector<8xf32>
    %119 = vector.shape_cast %118 : vector<8xf32> to vector<8x1xf32>
    %120 = vector.broadcast %119 : vector<8x1xf32> to vector<8x8xf32>
    %121 = arith.divf %117, %120 : vector<8x8xf32>
    %cst_44 = arith.constant dense<0.000000e+00> : vector<8x32xf32>
    %122 = tpu.matmul %121, %110, %cst_44 {dimension_numbers = #tpu.dot_dimension_numbers<[1], [0], [0], [1], [0, 0, 1, 1], [], []>} : vector<8x8xf32>, vector<8x32xf32>, vector<8x32xf32> -> vector<8x32xf32>
    %123 = tpu.concatenate %105, %122 in 1 : vector<8x32xf32>, vector<8x32xf32> -> vector<8x64xf32>
    %cst_45 = arith.constant dense<0.000000e+00> : vector<8x64xf32>
    %124 = tpu.matmul %123, %84, %cst_45 {dimension_numbers = #tpu.dot_dimension_numbers<[1], [0], [0], [1], [0, 0, 1, 1], [], []>} : vector<8x64xf32>, vector<64x64xf32>, vector<8x64xf32> -> vector<8x64xf32>
    %c5 = arith.constant 5 : index
    %c0_46 = arith.constant 0 : index
    %125 = vector.load %arg11[%c5, %c0_46] : memref<13x256xf32, #tpu.memory_space<vmem>>, vector<1x64xf32>
    %126 = vector.broadcast %125 : vector<1x64xf32> to vector<8x64xf32>
    %127 = arith.addf %124, %126 : vector<8x64xf32>
    %c128 = arith.constant 128 : index
    %c0_47 = arith.constant 0 : index
    %128 = vector.load %arg3[%c128, %c0_47] : memref<192x192xf32, #tpu.memory_space<vmem>>, vector<64x192xf32>
    %c128_48 = arith.constant 128 : index
    %c0_49 = arith.constant 0 : index
    %129 = vector.load %arg4[%c128_48, %c0_49] : memref<192x64xf32, #tpu.memory_space<vmem>>, vector<64x64xf32>
    %cst_50 = arith.constant dense<0.000000e+00> : vector<8x192xf32>
    %130 = tpu.matmul %127, %128, %cst_50 {dimension_numbers = #tpu.dot_dimension_numbers<[1], [0], [0], [1], [0, 0, 1, 1], [], []>} : vector<8x64xf32>, vector<64x192xf32>, vector<8x192xf32> -> vector<8x192xf32>
    %c3 = arith.constant 3 : index
    %c0_51 = arith.constant 0 : index
    %131 = vector.load %arg11[%c3, %c0_51] : memref<13x256xf32, #tpu.memory_space<vmem>>, vector<1x192xf32>
    %132 = vector.broadcast %131 : vector<1x192xf32> to vector<8x192xf32>
    %133 = arith.addf %130, %132 : vector<8x192xf32>
    %134 = vector.extract_strided_slice %133 {offsets = [0, 0], sizes = [8, 32], strides = [1, 1]} : vector<8x192xf32> to vector<8x32xf32>
    %cst_52 = arith.constant 0.176776692 : f32
    %135 = vector.broadcast %cst_52 : f32 to vector<8x32xf32>
    %136 = arith.mulf %134, %135 : vector<8x32xf32>
    %137 = vector.extract_strided_slice %133 {offsets = [0, 64], sizes = [8, 32], strides = [1, 1]} : vector<8x192xf32> to vector<8x32xf32>
    %138 = vector.extract_strided_slice %133 {offsets = [0, 128], sizes = [8, 32], strides = [1, 1]} : vector<8x192xf32> to vector<8x32xf32>
    %cst_53 = arith.constant dense<0.000000e+00> : vector<8x8xf32>
    %139 = tpu.matmul %136, %137, %cst_53 {dimension_numbers = #tpu.dot_dimension_numbers<[1], [1], [0], [0], [0, 0, 1, 0], [], []>} : vector<8x32xf32>, vector<8x32xf32>, vector<8x8xf32> -> vector<8x8xf32>
    %140 = arith.addf %139, %37 : vector<8x8xf32>
    %cst_54 = arith.constant dense<0xFF800000> : vector<8xf32>
    %141 = vector.multi_reduction <maximumf>, %140, %cst_54 [1] : vector<8x8xf32> to vector<8xf32>
    %142 = vector.shape_cast %141 : vector<8xf32> to vector<8x1xf32>
    %143 = vector.broadcast %142 : vector<8x1xf32> to vector<8x8xf32>
    %144 = arith.subf %140, %143 : vector<8x8xf32>
    %145 = math.exp %144 : vector<8x8xf32>
    %cst_55 = arith.constant dense<0.000000e+00> : vector<8xf32>
    %146 = vector.multi_reduction <add>, %145, %cst_55 [1] : vector<8x8xf32> to vector<8xf32>
    %147 = vector.shape_cast %146 : vector<8xf32> to vector<8x1xf32>
    %148 = vector.broadcast %147 : vector<8x1xf32> to vector<8x8xf32>
    %149 = arith.divf %145, %148 : vector<8x8xf32>
    %cst_56 = arith.constant dense<0.000000e+00> : vector<8x32xf32>
    %150 = tpu.matmul %149, %138, %cst_56 {dimension_numbers = #tpu.dot_dimension_numbers<[1], [0], [0], [1], [0, 0, 1, 1], [], []>} : vector<8x8xf32>, vector<8x32xf32>, vector<8x32xf32> -> vector<8x32xf32>
    %151 = vector.extract_strided_slice %133 {offsets = [0, 32], sizes = [8, 32], strides = [1, 1]} : vector<8x192xf32> to vector<8x32xf32>
    %cst_57 = arith.constant 0.176776692 : f32
    %152 = vector.broadcast %cst_57 : f32 to vector<8x32xf32>
    %153 = arith.mulf %151, %152 : vector<8x32xf32>
    %154 = vector.extract_strided_slice %133 {offsets = [0, 96], sizes = [8, 32], strides = [1, 1]} : vector<8x192xf32> to vector<8x32xf32>
    %155 = vector.extract_strided_slice %133 {offsets = [0, 160], sizes = [8, 32], strides = [1, 1]} : vector<8x192xf32> to vector<8x32xf32>
    %cst_58 = arith.constant dense<0.000000e+00> : vector<8x8xf32>
    %156 = tpu.matmul %153, %154, %cst_58 {dimension_numbers = #tpu.dot_dimension_numbers<[1], [1], [0], [0], [0, 0, 1, 0], [], []>} : vector<8x32xf32>, vector<8x32xf32>, vector<8x8xf32> -> vector<8x8xf32>
    %157 = arith.addf %156, %37 : vector<8x8xf32>
    %cst_59 = arith.constant dense<0xFF800000> : vector<8xf32>
    %158 = vector.multi_reduction <maximumf>, %157, %cst_59 [1] : vector<8x8xf32> to vector<8xf32>
    %159 = vector.shape_cast %158 : vector<8xf32> to vector<8x1xf32>
    %160 = vector.broadcast %159 : vector<8x1xf32> to vector<8x8xf32>
    %161 = arith.subf %157, %160 : vector<8x8xf32>
    %162 = math.exp %161 : vector<8x8xf32>
    %cst_60 = arith.constant dense<0.000000e+00> : vector<8xf32>
    %163 = vector.multi_reduction <add>, %162, %cst_60 [1] : vector<8x8xf32> to vector<8xf32>
    %164 = vector.shape_cast %163 : vector<8xf32> to vector<8x1xf32>
    %165 = vector.broadcast %164 : vector<8x1xf32> to vector<8x8xf32>
    %166 = arith.divf %162, %165 : vector<8x8xf32>
    %cst_61 = arith.constant dense<0.000000e+00> : vector<8x32xf32>
    %167 = tpu.matmul %166, %155, %cst_61 {dimension_numbers = #tpu.dot_dimension_numbers<[1], [0], [0], [1], [0, 0, 1, 1], [], []>} : vector<8x8xf32>, vector<8x32xf32>, vector<8x32xf32> -> vector<8x32xf32>
    %168 = tpu.concatenate %150, %167 in 1 : vector<8x32xf32>, vector<8x32xf32> -> vector<8x64xf32>
    %cst_62 = arith.constant dense<0.000000e+00> : vector<8x64xf32>
    %169 = tpu.matmul %168, %129, %cst_62 {dimension_numbers = #tpu.dot_dimension_numbers<[1], [0], [0], [1], [0, 0, 1, 1], [], []>} : vector<8x64xf32>, vector<64x64xf32>, vector<8x64xf32> -> vector<8x64xf32>
    %c6 = arith.constant 6 : index
    %c0_63 = arith.constant 0 : index
    %170 = vector.load %arg11[%c6, %c0_63] : memref<13x256xf32, #tpu.memory_space<vmem>>, vector<1x64xf32>
    %171 = vector.broadcast %170 : vector<1x64xf32> to vector<8x64xf32>
    %172 = arith.addf %169, %171 : vector<8x64xf32>
    %173 = arith.addf %172, %27 : vector<8x64xf32>
    %cst_64 = arith.constant 0.000000e+00 : f32
    %174 = vector.broadcast %cst_64 : f32 to vector<8x64xf32>
    %175 = arith.maximumf %173, %174 : vector<8x64xf32>
    %c0_65 = arith.constant 0 : index
    %c0_66 = arith.constant 0 : index
    %176 = vector.load %arg5[%c0_65, %c0_66] : memref<4x64xf32, #tpu.memory_space<vmem>>, vector<4x64xf32>
    %cst_67 = arith.constant dense<0.000000e+00> : vector<8x4xf32>
    %177 = tpu.matmul %175, %176, %cst_67 {dimension_numbers = #tpu.dot_dimension_numbers<[1], [1], [0], [0], [0, 0, 1, 0], [], []>} : vector<8x64xf32>, vector<4x64xf32>, vector<8x4xf32> -> vector<8x4xf32>
    %178 = tpu.iota {dimensions = array<i32: 0>} : vector<8x4xi32>
    %c3_i32_68 = arith.constant 3 : i32
    %179 = vector.broadcast %c3_i32_68 : i32 to vector<8x4xi32>
    %180 = arith.andi %178, %179 : vector<8x4xi32>
    %181 = tpu.iota {dimensions = array<i32: 1>} : vector<8x4xi32>
    %182 = arith.cmpi eq, %180, %181 : vector<8x4xi32>
    %cst_69 = arith.constant 0.000000e+00 : f32
    %183 = vector.broadcast %cst_69 : f32 to vector<8x4xf32>
    %184 = arith.select %182, %177, %183 : vector<8x4xi1>, vector<8x4xf32>
    %cst_70 = arith.constant dense<0.000000e+00> : vector<8xf32>
    %185 = vector.multi_reduction <add>, %184, %cst_70 [1] : vector<8x4xf32> to vector<8xf32>
    %186 = vector.shape_cast %185 : vector<8xf32> to vector<8x1xf32>
    %187 = tpu.iota {dimensions = array<i32: 1>} : vector<2x8xi32>
    %c2_i32_71 = arith.constant 2 : i32
    %188 = vector.broadcast %c2_i32_71 : i32 to vector<2x8xi32>
    %189 = arith.shrsi %187, %188 : vector<2x8xi32>
    %190 = tpu.iota {dimensions = array<i32: 0>} : vector<2x8xi32>
    %191 = arith.cmpi eq, %189, %190 : vector<2x8xi32>
    %192 = arith.extui %191 : vector<2x8xi1> to vector<2x8xi32>
    %193 = arith.sitofp %192 : vector<2x8xi32> to vector<2x8xf32>
    %194 = tpu.concatenate %20, %9, %186 in 1 : vector<8x32xf32>, vector<8x1xf32>, vector<8x1xf32> -> vector<8x34xf32>
    %cst_72 = arith.constant dense<0.000000e+00> : vector<2x34xf32>
    %195 = tpu.matmul %193, %194, %cst_72 {dimension_numbers = #tpu.dot_dimension_numbers<[1], [0], [0], [1], [0, 0, 1, 1], [], []>} : vector<2x8xf32>, vector<8x34xf32>, vector<2x34xf32> -> vector<2x34xf32>
    %196 = vector.extract_strided_slice %195 {offsets = [0, 0], sizes = [2, 32], strides = [1, 1]} : vector<2x34xf32> to vector<2x32xf32>
    %197 = vector.extract_strided_slice %195 {offsets = [0, 32], sizes = [2, 2], strides = [1, 1]} : vector<2x34xf32> to vector<2x2xf32>
    %c12 = arith.constant 12 : index
    %c0_73 = arith.constant 0 : index
    %198 = vector.load %arg11[%c12, %c0_73] : memref<13x256xf32, #tpu.memory_space<vmem>>, vector<1x2xf32>
    %199 = vector.broadcast %198 : vector<1x2xf32> to vector<2x2xf32>
    %200 = arith.addf %197, %199 : vector<2x2xf32>
    %201 = tpu.concatenate %196, %196, %196 in 1 : vector<2x32xf32>, vector<2x32xf32>, vector<2x32xf32> -> vector<2x96xf32>
    %c0_74 = arith.constant 0 : index
    %c0_75 = arith.constant 0 : index
    %202 = vector.load %arg6[%c0_74, %c0_75] : memref<96x206xf32, #tpu.memory_space<vmem>>, vector<96x206xf32>
    %cst_76 = arith.constant dense<0.000000e+00> : vector<2x206xf32>
    %203 = tpu.matmul %201, %202, %cst_76 {dimension_numbers = #tpu.dot_dimension_numbers<[1], [0], [0], [1], [0, 0, 1, 1], [], []>} : vector<2x96xf32>, vector<96x206xf32>, vector<2x206xf32> -> vector<2x206xf32>
    %c7 = arith.constant 7 : index
    %c0_77 = arith.constant 0 : index
    %204 = vector.load %arg11[%c7, %c0_77] : memref<13x256xf32, #tpu.memory_space<vmem>>, vector<1x206xf32>
    %205 = vector.broadcast %204 : vector<1x206xf32> to vector<2x206xf32>
    %206 = arith.addf %203, %205 : vector<2x206xf32>
    %207 = vector.extract_strided_slice %206 {offsets = [0, 0], sizes = [2, 64], strides = [1, 1]} : vector<2x206xf32> to vector<2x64xf32>
    %cst_78 = arith.constant 0.000000e+00 : f32
    %208 = vector.broadcast %cst_78 : f32 to vector<2x64xf32>
    %209 = arith.maximumf %207, %208 : vector<2x64xf32>
    %210 = vector.extract_strided_slice %206 {offsets = [0, 64], sizes = [2, 64], strides = [1, 1]} : vector<2x206xf32> to vector<2x64xf32>
    %cst_79 = arith.constant 0.000000e+00 : f32
    %211 = vector.broadcast %cst_79 : f32 to vector<2x64xf32>
    %212 = arith.maximumf %210, %211 : vector<2x64xf32>
    %213 = vector.extract_strided_slice %206 {offsets = [0, 128], sizes = [2, 64], strides = [1, 1]} : vector<2x206xf32> to vector<2x64xf32>
    %cst_80 = arith.constant 0.000000e+00 : f32
    %214 = vector.broadcast %cst_80 : f32 to vector<2x64xf32>
    %215 = arith.maximumf %213, %214 : vector<2x64xf32>
    %216 = vector.extract_strided_slice %206 {offsets = [0, 192], sizes = [2, 4], strides = [1, 1]} : vector<2x206xf32> to vector<2x4xf32>
    %cst_81 = arith.constant dense<0xFF800000> : vector<2xf32>
    %217 = vector.multi_reduction <maximumf>, %216, %cst_81 [1] : vector<2x4xf32> to vector<2xf32>
    %218 = vector.shape_cast %217 : vector<2xf32> to vector<2x1xf32>
    %219 = vector.broadcast %218 : vector<2x1xf32> to vector<2x4xf32>
    %220 = arith.subf %216, %219 : vector<2x4xf32>
    %221 = math.exp %220 : vector<2x4xf32>
    %cst_82 = arith.constant dense<0.000000e+00> : vector<2xf32>
    %222 = vector.multi_reduction <add>, %221, %cst_82 [1] : vector<2x4xf32> to vector<2xf32>
    %223 = vector.shape_cast %222 : vector<2xf32> to vector<2x1xf32>
    %224 = vector.broadcast %223 : vector<2x1xf32> to vector<2x4xf32>
    %225 = arith.divf %221, %224 : vector<2x4xf32>
    %226 = vector.extract_strided_slice %206 {offsets = [0, 196], sizes = [2, 4], strides = [1, 1]} : vector<2x206xf32> to vector<2x4xf32>
    %cst_83 = arith.constant dense<0xFF800000> : vector<2xf32>
    %227 = vector.multi_reduction <maximumf>, %226, %cst_83 [1] : vector<2x4xf32> to vector<2xf32>
    %228 = vector.shape_cast %227 : vector<2xf32> to vector<2x1xf32>
    %229 = vector.broadcast %228 : vector<2x1xf32> to vector<2x4xf32>
    %230 = arith.subf %226, %229 : vector<2x4xf32>
    %231 = math.exp %230 : vector<2x4xf32>
    %cst_84 = arith.constant dense<0.000000e+00> : vector<2xf32>
    %232 = vector.multi_reduction <add>, %231, %cst_84 [1] : vector<2x4xf32> to vector<2xf32>
    %233 = vector.shape_cast %232 : vector<2xf32> to vector<2x1xf32>
    %234 = vector.broadcast %233 : vector<2x1xf32> to vector<2x4xf32>
    %235 = arith.divf %231, %234 : vector<2x4xf32>
    %236 = vector.extract_strided_slice %206 {offsets = [0, 200], sizes = [2, 6], strides = [1, 1]} : vector<2x206xf32> to vector<2x6xf32>
    %cst_85 = arith.constant dense<0xFF800000> : vector<2xf32>
    %237 = vector.multi_reduction <maximumf>, %236, %cst_85 [1] : vector<2x6xf32> to vector<2xf32>
    %238 = vector.shape_cast %237 : vector<2xf32> to vector<2x1xf32>
    %239 = vector.broadcast %238 : vector<2x1xf32> to vector<2x6xf32>
    %240 = arith.subf %236, %239 : vector<2x6xf32>
    %241 = math.exp %240 : vector<2x6xf32>
    %cst_86 = arith.constant dense<0.000000e+00> : vector<2xf32>
    %242 = vector.multi_reduction <add>, %241, %cst_86 [1] : vector<2x6xf32> to vector<2xf32>
    %243 = vector.shape_cast %242 : vector<2xf32> to vector<2x1xf32>
    %244 = vector.broadcast %243 : vector<2x1xf32> to vector<2x6xf32>
    %245 = arith.divf %241, %244 : vector<2x6xf32>
    %246 = vector.extract_strided_slice %209 {offsets = [0, 0], sizes = [2, 32], strides = [1, 1]} : vector<2x64xf32> to vector<2x32xf32>
    %247 = vector.extract_strided_slice %209 {offsets = [0, 32], sizes = [2, 32], strides = [1, 1]} : vector<2x64xf32> to vector<2x32xf32>
    %248 = vector.extract_strided_slice %212 {offsets = [0, 0], sizes = [2, 32], strides = [1, 1]} : vector<2x64xf32> to vector<2x32xf32>
    %249 = vector.extract_strided_slice %212 {offsets = [0, 32], sizes = [2, 32], strides = [1, 1]} : vector<2x64xf32> to vector<2x32xf32>
    %250 = vector.extract_strided_slice %215 {offsets = [0, 0], sizes = [2, 32], strides = [1, 1]} : vector<2x64xf32> to vector<2x32xf32>
    %251 = vector.extract_strided_slice %215 {offsets = [0, 32], sizes = [2, 32], strides = [1, 1]} : vector<2x64xf32> to vector<2x32xf32>
    %252 = vector.extract_strided_slice %225 {offsets = [0, 0], sizes = [2, 1], strides = [1, 1]} : vector<2x4xf32> to vector<2x1xf32>
    %253 = vector.broadcast %252 : vector<2x1xf32> to vector<2x32xf32>
    %254 = arith.mulf %253, %246 : vector<2x32xf32>
    %255 = vector.extract_strided_slice %225 {offsets = [0, 1], sizes = [2, 1], strides = [1, 1]} : vector<2x4xf32> to vector<2x1xf32>
    %256 = vector.broadcast %255 : vector<2x1xf32> to vector<2x32xf32>
    %257 = arith.mulf %256, %247 : vector<2x32xf32>
    %258 = arith.addf %254, %257 : vector<2x32xf32>
    %259 = vector.extract_strided_slice %225 {offsets = [0, 2], sizes = [2, 1], strides = [1, 1]} : vector<2x4xf32> to vector<2x1xf32>
    %260 = vector.broadcast %259 : vector<2x1xf32> to vector<2x32xf32>
    %261 = arith.mulf %260, %250 : vector<2x32xf32>
    %262 = arith.addf %258, %261 : vector<2x32xf32>
    %263 = vector.extract_strided_slice %225 {offsets = [0, 3], sizes = [2, 1], strides = [1, 1]} : vector<2x4xf32> to vector<2x1xf32>
    %264 = vector.broadcast %263 : vector<2x1xf32> to vector<2x32xf32>
    %265 = arith.mulf %264, %251 : vector<2x32xf32>
    %266 = arith.addf %262, %265 : vector<2x32xf32>
    %267 = vector.extract_strided_slice %235 {offsets = [0, 0], sizes = [2, 1], strides = [1, 1]} : vector<2x4xf32> to vector<2x1xf32>
    %268 = vector.broadcast %267 : vector<2x1xf32> to vector<2x32xf32>
    %269 = arith.mulf %268, %248 : vector<2x32xf32>
    %270 = vector.extract_strided_slice %235 {offsets = [0, 1], sizes = [2, 1], strides = [1, 1]} : vector<2x4xf32> to vector<2x1xf32>
    %271 = vector.broadcast %270 : vector<2x1xf32> to vector<2x32xf32>
    %272 = arith.mulf %271, %249 : vector<2x32xf32>
    %273 = arith.addf %269, %272 : vector<2x32xf32>
    %274 = vector.extract_strided_slice %235 {offsets = [0, 2], sizes = [2, 1], strides = [1, 1]} : vector<2x4xf32> to vector<2x1xf32>
    %275 = vector.broadcast %274 : vector<2x1xf32> to vector<2x32xf32>
    %276 = arith.mulf %275, %250 : vector<2x32xf32>
    %277 = arith.addf %273, %276 : vector<2x32xf32>
    %278 = vector.extract_strided_slice %235 {offsets = [0, 3], sizes = [2, 1], strides = [1, 1]} : vector<2x4xf32> to vector<2x1xf32>
    %279 = vector.broadcast %278 : vector<2x1xf32> to vector<2x32xf32>
    %280 = arith.mulf %279, %251 : vector<2x32xf32>
    %281 = arith.addf %277, %280 : vector<2x32xf32>
    %282 = vector.extract_strided_slice %245 {offsets = [0, 0], sizes = [2, 1], strides = [1, 1]} : vector<2x6xf32> to vector<2x1xf32>
    %283 = vector.broadcast %282 : vector<2x1xf32> to vector<2x32xf32>
    %284 = arith.mulf %283, %246 : vector<2x32xf32>
    %285 = vector.extract_strided_slice %245 {offsets = [0, 1], sizes = [2, 1], strides = [1, 1]} : vector<2x6xf32> to vector<2x1xf32>
    %286 = vector.broadcast %285 : vector<2x1xf32> to vector<2x32xf32>
    %287 = arith.mulf %286, %247 : vector<2x32xf32>
    %288 = arith.addf %284, %287 : vector<2x32xf32>
    %289 = vector.extract_strided_slice %245 {offsets = [0, 2], sizes = [2, 1], strides = [1, 1]} : vector<2x6xf32> to vector<2x1xf32>
    %290 = vector.broadcast %289 : vector<2x1xf32> to vector<2x32xf32>
    %291 = arith.mulf %290, %248 : vector<2x32xf32>
    %292 = arith.addf %288, %291 : vector<2x32xf32>
    %293 = vector.extract_strided_slice %245 {offsets = [0, 3], sizes = [2, 1], strides = [1, 1]} : vector<2x6xf32> to vector<2x1xf32>
    %294 = vector.broadcast %293 : vector<2x1xf32> to vector<2x32xf32>
    %295 = arith.mulf %294, %249 : vector<2x32xf32>
    %296 = arith.addf %292, %295 : vector<2x32xf32>
    %297 = vector.extract_strided_slice %245 {offsets = [0, 4], sizes = [2, 1], strides = [1, 1]} : vector<2x6xf32> to vector<2x1xf32>
    %298 = vector.broadcast %297 : vector<2x1xf32> to vector<2x32xf32>
    %299 = arith.mulf %298, %250 : vector<2x32xf32>
    %300 = arith.addf %296, %299 : vector<2x32xf32>
    %301 = vector.extract_strided_slice %245 {offsets = [0, 5], sizes = [2, 1], strides = [1, 1]} : vector<2x6xf32> to vector<2x1xf32>
    %302 = vector.broadcast %301 : vector<2x1xf32> to vector<2x32xf32>
    %303 = arith.mulf %302, %251 : vector<2x32xf32>
    %304 = arith.addf %300, %303 : vector<2x32xf32>
    %305 = tpu.concatenate %266, %281, %304 in 1 : vector<2x32xf32>, vector<2x32xf32>, vector<2x32xf32> -> vector<2x96xf32>
    %c0_87 = arith.constant 0 : index
    %c0_88 = arith.constant 0 : index
    %306 = vector.load %arg7[%c0_87, %c0_88] : memref<96x106xf32, #tpu.memory_space<vmem>>, vector<96x106xf32>
    %cst_89 = arith.constant dense<0.000000e+00> : vector<2x106xf32>
    %307 = tpu.matmul %305, %306, %cst_89 {dimension_numbers = #tpu.dot_dimension_numbers<[1], [0], [0], [1], [0, 0, 1, 1], [], []>} : vector<2x96xf32>, vector<96x106xf32>, vector<2x106xf32> -> vector<2x106xf32>
    %c8 = arith.constant 8 : index
    %c0_90 = arith.constant 0 : index
    %308 = vector.load %arg11[%c8, %c0_90] : memref<13x256xf32, #tpu.memory_space<vmem>>, vector<1x106xf32>
    %309 = vector.broadcast %308 : vector<1x106xf32> to vector<2x106xf32>
    %310 = arith.addf %307, %309 : vector<2x106xf32>
    %311 = vector.extract_strided_slice %310 {offsets = [0, 0], sizes = [2, 32], strides = [1, 1]} : vector<2x106xf32> to vector<2x32xf32>
    %cst_91 = arith.constant 0.000000e+00 : f32
    %312 = vector.broadcast %cst_91 : f32 to vector<2x32xf32>
    %313 = arith.maximumf %311, %312 : vector<2x32xf32>
    %314 = vector.extract_strided_slice %310 {offsets = [0, 32], sizes = [2, 32], strides = [1, 1]} : vector<2x106xf32> to vector<2x32xf32>
    %cst_92 = arith.constant 0.000000e+00 : f32
    %315 = vector.broadcast %cst_92 : f32 to vector<2x32xf32>
    %316 = arith.maximumf %314, %315 : vector<2x32xf32>
    %317 = vector.extract_strided_slice %310 {offsets = [0, 64], sizes = [2, 32], strides = [1, 1]} : vector<2x106xf32> to vector<2x32xf32>
    %cst_93 = arith.constant 0.000000e+00 : f32
    %318 = vector.broadcast %cst_93 : f32 to vector<2x32xf32>
    %319 = arith.maximumf %317, %318 : vector<2x32xf32>
    %320 = vector.extract_strided_slice %310 {offsets = [0, 96], sizes = [2, 4], strides = [1, 1]} : vector<2x106xf32> to vector<2x4xf32>
    %cst_94 = arith.constant dense<0xFF800000> : vector<2xf32>
    %321 = vector.multi_reduction <maximumf>, %320, %cst_94 [1] : vector<2x4xf32> to vector<2xf32>
    %322 = vector.shape_cast %321 : vector<2xf32> to vector<2x1xf32>
    %323 = vector.broadcast %322 : vector<2x1xf32> to vector<2x4xf32>
    %324 = arith.subf %320, %323 : vector<2x4xf32>
    %325 = math.exp %324 : vector<2x4xf32>
    %cst_95 = arith.constant dense<0.000000e+00> : vector<2xf32>
    %326 = vector.multi_reduction <add>, %325, %cst_95 [1] : vector<2x4xf32> to vector<2xf32>
    %327 = vector.shape_cast %326 : vector<2xf32> to vector<2x1xf32>
    %328 = vector.broadcast %327 : vector<2x1xf32> to vector<2x4xf32>
    %329 = arith.divf %325, %328 : vector<2x4xf32>
    %330 = vector.extract_strided_slice %310 {offsets = [0, 100], sizes = [2, 4], strides = [1, 1]} : vector<2x106xf32> to vector<2x4xf32>
    %cst_96 = arith.constant dense<0xFF800000> : vector<2xf32>
    %331 = vector.multi_reduction <maximumf>, %330, %cst_96 [1] : vector<2x4xf32> to vector<2xf32>
    %332 = vector.shape_cast %331 : vector<2xf32> to vector<2x1xf32>
    %333 = vector.broadcast %332 : vector<2x1xf32> to vector<2x4xf32>
    %334 = arith.subf %330, %333 : vector<2x4xf32>
    %335 = math.exp %334 : vector<2x4xf32>
    %cst_97 = arith.constant dense<0.000000e+00> : vector<2xf32>
    %336 = vector.multi_reduction <add>, %335, %cst_97 [1] : vector<2x4xf32> to vector<2xf32>
    %337 = vector.shape_cast %336 : vector<2xf32> to vector<2x1xf32>
    %338 = vector.broadcast %337 : vector<2x1xf32> to vector<2x4xf32>
    %339 = arith.divf %335, %338 : vector<2x4xf32>
    %340 = vector.extract_strided_slice %310 {offsets = [0, 104], sizes = [2, 2], strides = [1, 1]} : vector<2x106xf32> to vector<2x2xf32>
    %cst_98 = arith.constant dense<0xFF800000> : vector<2xf32>
    %341 = vector.multi_reduction <maximumf>, %340, %cst_98 [1] : vector<2x2xf32> to vector<2xf32>
    %342 = vector.shape_cast %341 : vector<2xf32> to vector<2x1xf32>
    %343 = vector.broadcast %342 : vector<2x1xf32> to vector<2x2xf32>
    %344 = arith.subf %340, %343 : vector<2x2xf32>
    %345 = math.exp %344 : vector<2x2xf32>
    %cst_99 = arith.constant dense<0.000000e+00> : vector<2xf32>
    %346 = vector.multi_reduction <add>, %345, %cst_99 [1] : vector<2x2xf32> to vector<2xf32>
    %347 = vector.shape_cast %346 : vector<2xf32> to vector<2x1xf32>
    %348 = vector.broadcast %347 : vector<2x1xf32> to vector<2x2xf32>
    %349 = arith.divf %345, %348 : vector<2x2xf32>
    %350 = vector.extract_strided_slice %313 {offsets = [0, 0], sizes = [2, 16], strides = [1, 1]} : vector<2x32xf32> to vector<2x16xf32>
    %351 = vector.extract_strided_slice %313 {offsets = [0, 16], sizes = [2, 16], strides = [1, 1]} : vector<2x32xf32> to vector<2x16xf32>
    %352 = vector.extract_strided_slice %316 {offsets = [0, 0], sizes = [2, 16], strides = [1, 1]} : vector<2x32xf32> to vector<2x16xf32>
    %353 = vector.extract_strided_slice %316 {offsets = [0, 16], sizes = [2, 16], strides = [1, 1]} : vector<2x32xf32> to vector<2x16xf32>
    %354 = vector.extract_strided_slice %319 {offsets = [0, 0], sizes = [2, 16], strides = [1, 1]} : vector<2x32xf32> to vector<2x16xf32>
    %355 = vector.extract_strided_slice %319 {offsets = [0, 16], sizes = [2, 16], strides = [1, 1]} : vector<2x32xf32> to vector<2x16xf32>
    %356 = vector.extract_strided_slice %329 {offsets = [0, 0], sizes = [2, 1], strides = [1, 1]} : vector<2x4xf32> to vector<2x1xf32>
    %357 = vector.broadcast %356 : vector<2x1xf32> to vector<2x16xf32>
    %358 = arith.mulf %357, %350 : vector<2x16xf32>
    %359 = vector.extract_strided_slice %329 {offsets = [0, 1], sizes = [2, 1], strides = [1, 1]} : vector<2x4xf32> to vector<2x1xf32>
    %360 = vector.broadcast %359 : vector<2x1xf32> to vector<2x16xf32>
    %361 = arith.mulf %360, %351 : vector<2x16xf32>
    %362 = arith.addf %358, %361 : vector<2x16xf32>
    %363 = vector.extract_strided_slice %329 {offsets = [0, 2], sizes = [2, 1], strides = [1, 1]} : vector<2x4xf32> to vector<2x1xf32>
    %364 = vector.broadcast %363 : vector<2x1xf32> to vector<2x16xf32>
    %365 = arith.mulf %364, %354 : vector<2x16xf32>
    %366 = arith.addf %362, %365 : vector<2x16xf32>
    %367 = vector.extract_strided_slice %329 {offsets = [0, 3], sizes = [2, 1], strides = [1, 1]} : vector<2x4xf32> to vector<2x1xf32>
    %368 = vector.broadcast %367 : vector<2x1xf32> to vector<2x16xf32>
    %369 = arith.mulf %368, %355 : vector<2x16xf32>
    %370 = arith.addf %366, %369 : vector<2x16xf32>
    %371 = vector.extract_strided_slice %339 {offsets = [0, 0], sizes = [2, 1], strides = [1, 1]} : vector<2x4xf32> to vector<2x1xf32>
    %372 = vector.broadcast %371 : vector<2x1xf32> to vector<2x16xf32>
    %373 = arith.mulf %372, %352 : vector<2x16xf32>
    %374 = vector.extract_strided_slice %339 {offsets = [0, 1], sizes = [2, 1], strides = [1, 1]} : vector<2x4xf32> to vector<2x1xf32>
    %375 = vector.broadcast %374 : vector<2x1xf32> to vector<2x16xf32>
    %376 = arith.mulf %375, %353 : vector<2x16xf32>
    %377 = arith.addf %373, %376 : vector<2x16xf32>
    %378 = vector.extract_strided_slice %339 {offsets = [0, 2], sizes = [2, 1], strides = [1, 1]} : vector<2x4xf32> to vector<2x1xf32>
    %379 = vector.broadcast %378 : vector<2x1xf32> to vector<2x16xf32>
    %380 = arith.mulf %379, %354 : vector<2x16xf32>
    %381 = arith.addf %377, %380 : vector<2x16xf32>
    %382 = vector.extract_strided_slice %339 {offsets = [0, 3], sizes = [2, 1], strides = [1, 1]} : vector<2x4xf32> to vector<2x1xf32>
    %383 = vector.broadcast %382 : vector<2x1xf32> to vector<2x16xf32>
    %384 = arith.mulf %383, %355 : vector<2x16xf32>
    %385 = arith.addf %381, %384 : vector<2x16xf32>
    %386 = vector.extract_strided_slice %349 {offsets = [0, 0], sizes = [2, 1], strides = [1, 1]} : vector<2x2xf32> to vector<2x1xf32>
    %387 = vector.broadcast %386 : vector<2x1xf32> to vector<2x16xf32>
    %388 = arith.mulf %387, %354 : vector<2x16xf32>
    %389 = vector.extract_strided_slice %349 {offsets = [0, 1], sizes = [2, 1], strides = [1, 1]} : vector<2x2xf32> to vector<2x1xf32>
    %390 = vector.broadcast %389 : vector<2x1xf32> to vector<2x16xf32>
    %391 = arith.mulf %390, %355 : vector<2x16xf32>
    %392 = arith.addf %388, %391 : vector<2x16xf32>
    %393 = tpu.concatenate %370, %385, %392 in 1 : vector<2x16xf32>, vector<2x16xf32>, vector<2x16xf32> -> vector<2x48xf32>
    %c0_100 = arith.constant 0 : index
    %c0_101 = arith.constant 0 : index
    %394 = vector.load %arg8[%c0_100, %c0_101] : memref<48x24xf32, #tpu.memory_space<vmem>>, vector<48x24xf32>
    %cst_102 = arith.constant dense<0.000000e+00> : vector<2x24xf32>
    %395 = tpu.matmul %393, %394, %cst_102 {dimension_numbers = #tpu.dot_dimension_numbers<[1], [0], [0], [1], [0, 0, 1, 1], [], []>} : vector<2x48xf32>, vector<48x24xf32>, vector<2x24xf32> -> vector<2x24xf32>
    %c9 = arith.constant 9 : index
    %c0_103 = arith.constant 0 : index
    %396 = vector.load %arg11[%c9, %c0_103] : memref<13x256xf32, #tpu.memory_space<vmem>>, vector<1x24xf32>
    %397 = vector.broadcast %396 : vector<1x24xf32> to vector<2x24xf32>
    %398 = arith.addf %395, %397 : vector<2x24xf32>
    %cst_104 = arith.constant 0.000000e+00 : f32
    %399 = vector.broadcast %cst_104 : f32 to vector<2x24xf32>
    %400 = arith.maximumf %398, %399 : vector<2x24xf32>
    %401 = vector.extract_strided_slice %400 {offsets = [0, 0], sizes = [2, 8], strides = [1, 1]} : vector<2x24xf32> to vector<2x8xf32>
    %402 = vector.extract_strided_slice %400 {offsets = [0, 8], sizes = [2, 8], strides = [1, 1]} : vector<2x24xf32> to vector<2x8xf32>
    %403 = vector.extract_strided_slice %400 {offsets = [0, 16], sizes = [2, 8], strides = [1, 1]} : vector<2x24xf32> to vector<2x8xf32>
    %404 = tpu.concatenate %200, %401, %200, %402, %403 in 1 : vector<2x2xf32>, vector<2x8xf32>, vector<2x2xf32>, vector<2x8xf32>, vector<2x8xf32> -> vector<2x28xf32>
    %c0_105 = arith.constant 0 : index
    %c0_106 = arith.constant 0 : index
    %405 = vector.load %arg9[%c0_105, %c0_106] : memref<28x26xf32, #tpu.memory_space<vmem>>, vector<28x26xf32>
    %cst_107 = arith.constant dense<0.000000e+00> : vector<2x26xf32>
    %406 = tpu.matmul %404, %405, %cst_107 {dimension_numbers = #tpu.dot_dimension_numbers<[1], [0], [0], [1], [0, 0, 1, 1], [], []>} : vector<2x28xf32>, vector<28x26xf32>, vector<2x26xf32> -> vector<2x26xf32>
    %c10 = arith.constant 10 : index
    %c0_108 = arith.constant 0 : index
    %407 = vector.load %arg11[%c10, %c0_108] : memref<13x256xf32, #tpu.memory_space<vmem>>, vector<1x26xf32>
    %408 = vector.broadcast %407 : vector<1x26xf32> to vector<2x26xf32>
    %409 = arith.addf %406, %408 : vector<2x26xf32>
    %c0_109 = arith.constant 0 : index
    %c0_110 = arith.constant 0 : index
    %410 = vector.load %arg10[%c0_109, %c0_110] : memref<26x19xf32, #tpu.memory_space<vmem>>, vector<26x19xf32>
    %cst_111 = arith.constant dense<0.000000e+00> : vector<2x19xf32>
    %411 = tpu.matmul %409, %410, %cst_111 {dimension_numbers = #tpu.dot_dimension_numbers<[1], [0], [0], [1], [0, 0, 1, 1], [], []>} : vector<2x26xf32>, vector<26x19xf32>, vector<2x19xf32> -> vector<2x19xf32>
    %c11 = arith.constant 11 : index
    %c0_112 = arith.constant 0 : index
    %412 = vector.load %arg11[%c11, %c0_112] : memref<13x256xf32, #tpu.memory_space<vmem>>, vector<1x19xf32>
    %413 = vector.broadcast %412 : vector<1x19xf32> to vector<2x19xf32>
    %414 = arith.addf %411, %413 : vector<2x19xf32>
    %415 = vector.extract_strided_slice %414 {offsets = [0, 0], sizes = [2, 1], strides = [1, 1]} : vector<2x19xf32> to vector<2x1xf32>
    %cst_113 = arith.constant 0.000000e+00 : f32
    %416 = vector.broadcast %cst_113 : f32 to vector<2x1xf32>
    %417 = arith.subf %416, %415 : vector<2x1xf32>
    %418 = math.exp %417 : vector<2x1xf32>
    %cst_114 = arith.constant 1.000000e+00 : f32
    %419 = vector.broadcast %cst_114 : f32 to vector<2x1xf32>
    %420 = arith.addf %419, %418 : vector<2x1xf32>
    %cst_115 = arith.constant 1.000000e+00 : f32
    %421 = vector.broadcast %cst_115 : f32 to vector<2x1xf32>
    %422 = arith.divf %421, %420 : vector<2x1xf32>
    %423 = vector.extract_strided_slice %414 {offsets = [0, 1], sizes = [2, 9], strides = [1, 1]} : vector<2x19xf32> to vector<2x9xf32>
    %424 = vector.extract_strided_slice %414 {offsets = [0, 10], sizes = [2, 9], strides = [1, 1]} : vector<2x19xf32> to vector<2x9xf32>
    %425 = arith.subf %423, %424 : vector<2x9xf32>
    %426 = tpu.concatenate %422, %423, %425 in 1 : vector<2x1xf32>, vector<2x9xf32>, vector<2x9xf32> -> vector<2x19xf32>
    %c0_116 = arith.constant 0 : index
    %c0_117 = arith.constant 0 : index
    %427 = vector.load %arg12[%c0_116, %c0_117] : memref<2x19xf32, #tpu.memory_space<vmem>>, vector<2x19xf32>
    tpu.vector_store %arg12[%c0_116, %c0_117], %426 {strides = array<i32>} : memref<2x19xf32, #tpu.memory_space<vmem>>, vector<2x19xf32>,
    return
  }
}

</mosaic_0001>

<bundles_post_ra>
// kernel: mtc_forward.1
= control target key start
LH: loop header
LB: loop body
LE: loop exit
PB: predicated region body
PF: predicated region fallthrough
CT: control target
= control target key end

     0   :  { %17 = vsyncpa [#allocation3], 0  ;;  %s4121_s0 = inlined_call_operand.vmem [shape: s32[8,1], index: 0, kind: input, shape index: {}]   ;;  %s4122_s1 = inlined_call_operand.vmem [shape: f32[36,9], index: 1, kind: input, shape index: {}]   ;;  %s4123_s2 = inlined_call_operand.vmem [shape: f32[8,128], index: 2, kind: input, shape index: {}]   ;;  %s4124_s3 = inlined_call_operand.vmem [shape: f32[192,192], index: 3, kind: input, shape index: {}]   ;;  %s4125_s4 = inlined_call_operand.vmem [shape: f32[192,64], index: 4, kind: input, shape index: {}]   ;;  %s4126_s5 = inlined_call_operand.vmem [shape: f32[4,64], index: 5, kind: input, shape index: {}]   ;;  %s4127_s6 = inlined_call_operand.hbm [shape: f32[96,206], index: 6, kind: input, shape index: {}]   ;;  %s4128_s7 = inlined_call_operand.vmem [shape: f32[96,106], index: 7, kind: input, shape index: {}]   ;;  %s4129_s8 = inlined_call_operand.vmem [shape: f32[48,24], index: 8, kind: input, shape index: {}]   ;;  %s4130_s9 = inlined_call_operand.vmem [shape: f32[28,26], index: 9, kind: input, shape index: {}]   ;;  %s4131_s10 = inlined_call_operand.vmem [shape: f32[26,19], index: 10, kind: input, shape index: {}]   ;;  %s4132_s11 = inlined_call_operand.hbm [shape: f32[13,256], index: 11, kind: input, shape index: {}]   ;;  %s4133_s12 = inlined_call_operand.vmem [shape: f32[2,19], index: 12, kind: output, shape index: {}]  }
   0x1   :  { %18 = vsyncpa [#allocation5], 0  ;;  %s3339_s21 = smov [#allocation2]  }
   0x2   :  { %s36_s22 = sshll.u32 %s3339_s21, 4  ;;  %s37_s22 = int_to_ptr.vmem [resolvable:$true] %s36_s22 }
   0x3   :  { %s3303_s23 = scalar_lea.vmem %s37_s22, 3072  ;;  %p3308_p1 = scmp.lt.s32.totalorder %s37_s22, %s37_s22 }
   0x4   :  { %p3304_p0 = scmp.ne.s32.totalorder %s37_s22, %s3303_s23  ;;  %p3309_p2 = scmp.lt.s32.totalorder %s3303_s23, %s3303_s23 }
   0x6   :  { %p3310_p3 = por %p3309_p2, %p3308_p1 }
   0x8   :  { %p3311_p4 = pnand %p3310_p3, %p3304_p0 }
   0xa   :  { %3314 = shalt.err (!%p3311_p4)
}
   0xb   :  { %s3340_s24 = smov 256   ;;  %s3341_s25 = smov 16  }
   0xc   :  { %42 = dma.hbm_to_vmem [thread:$0]  %s4127_s6, 3072, %s37_s22, [#allocation3], %s3340_s24, %s3340_s24, %s3341_s25  }
   0xd   :  { %s3342_s28 = smov [#allocation4]  }
   0xe   :  { %s56_s29 = sshll.u32 %s3342_s28, 4  ;;  %s57_s29 = int_to_ptr.vmem [resolvable:$true] %s56_s29 }
   0xf   :  { %s3323_s30 = scalar_lea.vmem %s57_s29, 512  ;;  %p3328_p6 = scmp.lt.s32.totalorder %s57_s29, %s57_s29 }
  0x10   :  { %p3324_p5 = scmp.ne.s32.totalorder %s57_s29, %s3323_s30  ;;  %p3329_p7 = scmp.lt.s32.totalorder %s3323_s30, %s3323_s30 }
  0x12   :  { %p3330_p8 = por %p3329_p7, %p3328_p6 }
  0x14   :  { %p3331_p9 = pnand %p3330_p8, %p3324_p5 }
  0x16   :  { %3334 = shalt.err (!%p3331_p9)
}
  0x17   :  { %62 = dma.hbm_to_vmem [thread:$0]  %s4132_s11, 512, %s57_s29, [#allocation5], %s3340_s24, %s3340_s24, %s3341_s25  }
  0x18   :  { %3335 = dma.done.wait [#allocation3], 3072  }
  0x19   :  { %3336 = vsyncadd [#allocation3], 4294964224 }
  0x1a   :  { %3337 = dma.done.wait [#allocation5], 512  }
  0x1b   :  { %3338 = vsyncadd [#allocation5], 4294966784  ;;  %v3343_v0 = vmov 0   ;;  %v3344_v1 = vmov 0.0   ;;  %vm87_vm0 = vcmask 1043456   ;;  %vm3345_vm1 = vmmov 0  }
  0x1c   :  { %3217 = vset.pattern.permute.xlu0 %v3343_v0  ;;  %2960 = vmatprep.subr.mxu0 %v3344_v1  ;;  %v71_v2 = vld [vmem:[%s4121_s0] sm:$0xff]  ;;  %v81_v4 = vld [vmem:[%s4122_s1 + $0x18] sm:$0xff]  ;;  %v80_v5 = vld [vmem:[%s4122_s1 + $0x10] sm:$0xff]  ;;  %v69_v8 = vlaneseq  ;;  %vm83_vm2 = vcmask 293888   ;;  %vm178_vm4 = vcmask 64512   ;;  %vm300_vm5 = vcmask 523264  }
  0x1d   :  { %2973 = vmatprep.subr.mxu1 %v3344_v1  ;;  %2970 = vmatprep.mubr.msk.f32.mxu0 %vm3345_vm1, %v3344_v1  ;;  %v82_v3 = vld [vmem:[%s4122_s1 + $0x20] sm:$0xf]  ;;  %v79_v6 = vld [vmem:[%s4122_s1 + $0x8] sm:$0xff]  ;;  %v278_v13 = vld [vmem:[%s4124_s3 + $0x78] sm:$0xff]  ;;  %s3346_s15 = smov 64   ;;  %s3347_s16 = smov 32  }
  0x1e   :  { %2975 = vmatprep.mubr.msk.f32.mxu1 %vm3345_vm1, %v3344_v1  ;;  %73 = vperm.xlu0 %3217, %v71_v2   ;;  %v78_v7 = vld [vmem:[%s4122_s1] sm:$0xff]  ;;  %v3490_v9 = vand.u32 127, %v69_v8  ;;  %v277_v14 = vld [vmem:[%s4124_s3 + $0x70] sm:$0xff]  ;;  %v276_v16 = vld [vmem:[%s4124_s3 + $0x68] sm:$0xff]  ;;  %v3559_v35 = vshrl.u32 %v69_v8, 7  ;;  %vm379_vm6 = vcmask 261120  }
  0x1f   :  { %2961 = vmatpush3.msk.msra.mxu0 %vm87_vm0, %v82_v3  ;;  %v185_v12 = vld [vmem:[%s4123_s2] sm:$0xff]  ;;  %v274_v19 = vld [vmem:[%s4124_s3 + $0x58] sm:$0xff]  ;;  %v273_v20 = vld [vmem:[%s4124_s3 + $0x50] sm:$0xff]  ;;  %v3348_v49 = vmov -1e+30   ;;  %s3349_s17 = smov 96  }
  0x20   :  { %2962 = vmatprep.subr.mxu0 %v3344_v1  ;;  %2974 = vmatpush3.msra.mxu1 %v185_v12  ;;  %v275_v17 = vld [vmem:[%s4124_s3 + $0x60] sm:$0xff]  ;;  %v272_v21 = vld [vmem:[%s4124_s3 + $0x48] sm:$0xff]  ;;  %v270_v23 = vld [vmem:[%s4124_s3 + $0x38] sm:$0xff]  ;;  %v3562_v36 = vsub.s32 0, %v3559_v35  ;;  %v3568_v41 = vsub.s32 1, %v3559_v35  ;;  %v259_v47 = vshra.s32 %v3559_v35, 2 }
  0x21   :  { %2963 = vmatpush3.msra.mxu0 %v81_v4  ;;  %320 = vmatprep.subr.mxu1 %v278_v13  ;;  %v271_v22 = vld [vmem:[%s4124_s3 + $0x40] sm:$0xff]  ;;  %v269_v24 = vld [vmem:[%s4124_s3 + $0x30] sm:$0xff]  ;;  %v268_v25 = vld [vmem:[%s4124_s3 + $0x28] sm:$0xff]  ;;  %v260_v48 = vshra.s32 %v3490_v9, 2  ;;  %s3350_s14 = smov 8   ;;  %s3351_s6 = smov 24  }
  0x22   :  { %2964 = vmatprep.subr.mxu0 %v3344_v1  ;;  %v267_v26 = vld [vmem:[%s4124_s3 + $0x20] sm:$0xff]  ;;  %v266_v27 = vld [vmem:[%s4124_s3 + $0x18] sm:$0xff]  ;;  %v265_v28 = vld [vmem:[%s4124_s3 + $0x10] sm:$0xff]  ;;  %vm1906_vm9 = vcmask 31744   ;;  %vm180_vm10 = vcmask 130048   ;;  %vm182_vm12 = vcmask 195584  }
  0x23   :  { %2965 = vmatpush3.msra.mxu0 %v80_v5  ;;  %v264_v29 = vld [vmem:[%s4124_s3 + $0x8] sm:$0xff]  ;;  %v263_v30 = vld [vmem:[%s4124_s3] sm:$0xff]  ;;  %vm261_vm7 = vcmp.eq.s32.totalorder %v259_v47, %v260_v48  ;;  %vm1910_vm13 = vcmp.eq.s32.totalorder %v260_v48, %v3559_v35  ;;  %vm1914_vm14 = vcmask 269312   ;;  %vm2041_vm15 = vcmask 785408   ;;  %s3380_s19 = smov 80   ;;  %s3381_s24 = smov 48  }
  0x24   :  { %2966 = vmatprep.subr.mxu0 %v3344_v1  ;;  %v186_v31 = vld [vmem:[#allocation4] ss:$0 sm:$0xff]  ;;  %v288_v37 = vld [vmem:[#allocation4 + $0x1] ss:$8 sm:$0x3]  ;;  %v3581_v50 = vsel %vm261_vm7, 0.0, %v3348_v49 }
  0x25   :  { %2967 = vmatpush3.msra.mxu0 %v79_v6  ;;  %v293_v38 = vrot.slane %v288_v37, %v3562_v36  ;;  %v297_v42 = vrot.slane %v288_v37, %v3568_v41  ;;  %v792_v37 = vld [vmem:[%s4124_s3 + $0xc0] sm:$0xff]  ;;  %v786_v49 = vld [vmem:[%s4124_s3 + $0x90] sm:$0xff]  ;;  %v2021_v48 = vld [vmem:[#allocation2 + $0x88] sm:$0xff]  ;;  %vm2162_vm7 = vcmask 41984   ;;  %s3385_s22 = smov 119   ;;  %s3386_s23 = smov 9  }
  0x26   :  { %2968 = vmatprep.subr.mxu0 %v3344_v1 }
  0x27   :  { %2969 = vmatpush3.msra.mxu0 %v78_v7 }
  0x28   :  { %2978 = vmatprep.subr.mxu0 %v3344_v1 }
  0x99   :  { %v74_v10 = vpop.permute.xlu0 %73 }
  0x9a   :  { %vm75_vm3 = vcmp.eq.s32.totalorder %v3490_v9, %v74_v10 }
  0x9b   :  { %v2827_v11 = vsel %vm75_vm3, 1.0, %v3344_v1  ;;  %vm2135_vm3 = vcmask 583200  }
  0x9c   :  { %2971 = vmatmul.mubr.msk.f32.vlgmr.msra.gmra.mxu0 %vm83_vm2, %v2827_v11  ;;  %vm2151_vm2 = vcmask 632384  }
  0x9d   :  { %2980 = vmatprep.mubr.msk.f32.mxu0 %vm3345_vm1, %v3344_v1 }
 0x15c   :  { %v3505_v15 = vpop.f32.mrf.mxu0 }
 0x15d   :  { %2976 = vmatmul.mubr.msk.f32.vlgmr.msra.gmra.mxu1 %vm178_vm4, %v3505_v15 }
 0x15e   :  { %v2972_v18 = vpop.f32.mrf.mxu0  ;;  %321 = vmatpush1.msra.mxu1 %v277_v14  ;;  %368 = vmatprep.mubr.f32.mxu1 %v3344_v1 }
 0x15f   :  { %322 = vmatprep.subr.mxu1 %v276_v16 }
 0x160   :  { %323 = vmatpush1.msra.mxu1 %v275_v17 }
 0x161   :  { %324 = vmatprep.subr.mxu1 %v274_v19  ;;  %v286_v19 = vld [vmem:[%s4125_s4 + $0x38] sm:$0xff] }
 0x162   :  { %325 = vmatpush1.msra.mxu1 %v273_v20  ;;  %v285_v20 = vld [vmem:[%s4125_s4 + $0x30] sm:$0xff] }
 0x163   :  { %326 = vmatprep.subr.mxu1 %v272_v21  ;;  %v284_v21 = vld [vmem:[%s4125_s4 + $0x28] sm:$0xff] }
 0x164   :  { %327 = vmatpush1.msra.mxu1 %v271_v22  ;;  %v283_v22 = vld [vmem:[%s4125_s4 + $0x20] sm:$0xff] }
 0x165   :  { %328 = vmatprep.subr.mxu1 %v270_v23  ;;  %v282_v23 = vld [vmem:[%s4125_s4 + $0x18] sm:$0xff] }
 0x166   :  { %329 = vmatpush1.msra.mxu1 %v269_v24  ;;  %v281_v24 = vld [vmem:[%s4125_s4 + $0x10] sm:$0xff] }
 0x167   :  { %330 = vmatprep.subr.mxu1 %v268_v25  ;;  %v280_v25 = vld [vmem:[%s4125_s4 + $0x8] sm:$0xff] }
 0x168   :  { %331 = vmatpush1.msra.mxu1 %v267_v26  ;;  %v279_v26 = vld [vmem:[%s4125_s4] sm:$0xff] }
 0x169   :  { %332 = vmatprep.subr.mxu1 %v266_v27  ;;  %v799_v27 = vld [vmem:[%s4124_s3 + $0xf8] sm:$0xff] }
 0x16a   :  { %333 = vmatpush1.msra.mxu1 %v265_v28  ;;  %v798_v28 = vld [vmem:[%s4124_s3 + $0xf0] sm:$0xff] }
 0x16b   :  { %334 = vmatprep.subr.mxu1 %v264_v29  ;;  %v797_v29 = vld [vmem:[%s4124_s3 + $0xe8] sm:$0xff] }
 0x16c   :  { %335 = vmatpush1.msra.mxu1 %v263_v30  ;;  %v796_v30 = vld [vmem:[%s4124_s3 + $0xe0] sm:$0xff] }
 0x16d   :  { %2993 = vmatprep.subr.mxu1 %v3344_v1 }
 0x21d   :  { %v255_v32 = vpop.f32.mrf.mxu1 }
 0x21e   :  { %v3553_v33 = vadd.f32 %v255_v32, %v186_v31  ;;  %v795_v31 = vld [vmem:[%s4124_s3 + $0xd8] sm:$0xff]  ;;  %v794_v32 = vld [vmem:[%s4124_s3 + $0xd0] sm:$0xff] }
 0x21f   :  { %v2977_v34 = vpop.f32.mrf.mxu1 }
 0x220   :  { %2832 = vmatmul.mubr.msk.f32.vlgmr.msra.gmra.mxu1 %vm300_vm5, %v3553_v33  ;;  %v793_v34 = vld [vmem:[%s4124_s3 + $0xc8] sm:$0xff] }
 0x221   :  { %2995 = vmatprep.mubr.msk.f32.mxu1 %vm3345_vm1, %v3344_v1 }
 0x2e0   :  { %v370_v39 = vpop.f32.mrf.mxu1 }
 0x2e1   :  { %v371_v40 = vadd.f32 %v370_v39, %v293_v38  ;;  %v791_v38 = vld [vmem:[%s4124_s3 + $0xb8] sm:$0xff]  ;;  %v790_v39 = vld [vmem:[%s4124_s3 + $0xb0] sm:$0xff] }
 0x2e2   :  { %v372_v43 = vpop.f32.mrf.mxu1 }
 0x2e3   :  { %377 = vrot.lane.b32.xlu0 %v371_v40, %s3346_s15  ;;  %v375_v45 = vmul.f32 0.17677669, %v371_v40  ;;  %v373_v46 = vadd.f32 %v372_v43, %v297_v42  ;;  %v788_v42 = vld [vmem:[%s4124_s3 + $0xa0] sm:$0xff]  ;;  %v787_v43 = vld [vmem:[%s4124_s3 + $0x98] sm:$0xff] }
 0x2e7   :  { %541 = vrot.lane.b32.xlu0 %v371_v40, %s3347_s16  ;;  %v789_v40 = vld [vmem:[%s4124_s3 + $0xa8] sm:$0xff] }
 0x355   :  { %v378_v44 = vpop.permute.xlu0 %377 }
 0x356   :  { %2979 = vmatpush3.xpose.msk.msra.mxu0 %vm379_vm6, %v378_v44 }
 0x357   :  { %2983 = vmatprep.subr.mxu0 %v3344_v1 }
 0x359   :  { %2981 = vmatmul.mubr.msk.f32.vlgmr.msra.gmra.mxu0 %vm379_vm6, %v375_v45  ;;  %v542_v63 = vpop.permute.xlu0 %541 }
 0x35a   :  { %2984 = vmatpush3.msra.mxu0 %v373_v46  ;;  %2985 = vmatprep.mubr.msk.f32.mxu0 %vm3345_vm1, %v3344_v1 }
 0x35b   :  { %2988 = vmatprep.subr.mxu0 %v3344_v1 }
 0x419   :  { %v451_v51 = vpop.f32.mrf.mxu0 }
 0x41a   :  { %v452_v52 = vadd.f32 %v451_v51, %v3581_v50  ;;  %v785_v51 = vld [vmem:[%s4124_s3 + $0x88] sm:$0xff] }
 0x41b   :  { %v2982_v53 = vpop.f32.mrf.mxu0 }
 0x41c   :  { %v455_v54 = vsel %vm178_vm4, %v452_v52, -inf  ;;  %v710_v53 = vld [vmem:[#allocation4 + $0x4] ss:$0 sm:$0xff] }
 0x41d   :  { %456 = vmax.xlane.f32.xlu1 %v455_v54 }
 0x4a6   :  { %v457_v55 = vpop.xlane.xlu1 %456 }
 0x4a7   :  { %v458_v56 = vsub.f32 %v452_v52, %v457_v55  ;;  %v784_v52 = vld [vmem:[%s4124_s3 + $0x80] sm:$0xff] }
 0x4a9   :  { %v459_v57 = vmul.f32 1.442695, %v458_v56 }
 0x4ab   :  { %3243 = vpow2.f32 %v459_v57  ;;  %v809_v57 = vld [vmem:[#allocation4 + $0x2] ss:$8 sm:$0x3] }
 0x4b8   :  { %v3244_v58 = vpop.eup %3243 }
 0x4b9   :  { %v461_v59 = vsel %vm178_vm4, %v3244_v58, 0.0 }
 0x4ba   :  { %462 = vadd.xlane.f32.xlu1 %v461_v59  ;;  %v818_v59 = vrot.slane %v809_v57, %v3568_v41 }
 0x4cb   :  { %539 = vrot.lane.b32.xlu1 %v375_v45, %s3349_s17 }
 0x543   :  { %v463_v60 = vpop.xlane.xlu1 %462 }
 0x544   :  { %3245 = vrcp.f32 %v463_v60 }
 0x547   :  { %v540_v0 = vpop.permute.xlu1 %539 }
 0x551   :  { %v3246_v61 = vpop.eup %3245 }
 0x552   :  { %v465_v62 = vmul.f32 %v3246_v61, %v3244_v58  ;;  %v814_v58 = vrot.slane %v809_v57, %v3562_v36 }
 0x554   :  { %2986 = vmatmul.mubr.msk.f32.vlgmr.msra.gmra.mxu0 %vm178_vm4, %v465_v62 }
 0x555   :  { %2989 = vmatpush3.xpose.msk.msra.mxu0 %vm379_vm6, %v542_v63  ;;  %2990 = vmatprep.mubr.msk.f32.mxu0 %vm3345_vm1, %v3344_v1 }
 0x556   :  { %2998 = vmatprep.subr.mxu0 %v3344_v1 }
 0x558   :  { %2991 = vmatmul.mubr.msk.f32.vlgmr.msra.gmra.mxu0 %vm379_vm6, %v540_v0 }
 0x559   :  { %3014 = vmatprep.mubr.msk.f32.mxu0 %vm3345_vm1, %v3344_v1  ;;  %2999 = vmatpush3.msra.mxu0 %v286_v19 }
 0x55a   :  { %3000 = vmatprep.subr.mxu0 %v3344_v1 }
 0x55b   :  { %3001 = vmatpush3.msra.mxu0 %v285_v20 }
 0x55c   :  { %3002 = vmatprep.subr.mxu0 %v3344_v1 }
 0x55d   :  { %3003 = vmatpush3.msra.mxu0 %v284_v21 }
 0x55e   :  { %3004 = vmatprep.subr.mxu0 %v3344_v1 }
 0x55f   :  { %3005 = vmatpush3.msra.mxu0 %v283_v22 }
 0x560   :  { %3006 = vmatprep.subr.mxu0 %v3344_v1 }
 0x561   :  { %3007 = vmatpush3.msra.mxu0 %v282_v23 }
 0x562   :  { %3008 = vmatprep.subr.mxu0 %v3344_v1 }
 0x563   :  { %3009 = vmatpush3.msra.mxu0 %v281_v24 }
 0x564   :  { %3010 = vmatprep.subr.mxu0 %v3344_v1 }
 0x565   :  { %3011 = vmatpush3.msra.mxu0 %v280_v25 }
 0x566   :  { %3012 = vmatprep.subr.mxu0 %v3344_v1 }
 0x567   :  { %3013 = vmatpush3.msra.mxu0 %v279_v26 }
 0x568   :  { %3017 = vmatprep.subr.mxu0 %v3344_v1 }
 0x614   :  { %v3595_v2 = vpop.f32.mrf.mxu0 }
 0x616   :  { %v2987_v3 = vpop.f32.mrf.mxu0 }
 0x618   :  { %v613_v4 = vpop.f32.mrf.mxu0 }
 0x619   :  { %v614_v5 = vadd.f32 %v613_v4, %v3581_v50 }
 0x61a   :  { %v2992_v6 = vpop.f32.mrf.mxu0 }
 0x61b   :  { %v617_v7 = vsel %vm178_vm4, %v614_v5, -inf }
 0x61c   :  { %618 = vmax.xlane.f32.xlu0 %v617_v7 }
 0x632   :  { %629 = vrot.lane.b32.xlu0 %v373_v46, %s3349_s17 }
 0x6a5   :  { %v619_v8 = vpop.xlane.xlu0 %618 }
 0x6a6   :  { %v620_v10 = vsub.f32 %v614_v5, %v619_v8 }
 0x6a8   :  { %v621_v11 = vmul.f32 1.442695, %v620_v10 }
 0x6a9   :  { %v630_v12 = vpop.permute.xlu0 %629 }
 0x6aa   :  { %3247 = vpow2.f32 %v621_v11  ;;  %2994 = vmatpush3.msra.mxu1 %v630_v12 }
 0x6ab   :  { %840 = vmatprep.subr.mxu1 %v799_v27 }
 0x6b7   :  { %v3248_v13 = vpop.eup %3247 }
 0x6b8   :  { %v623_v14 = vsel %vm178_vm4, %v3248_v13, 0.0 }
 0x6b9   :  { %624 = vadd.xlane.f32.xlu1 %v623_v14 }
 0x742   :  { %v625_v16 = vpop.xlane.xlu1 %624 }
 0x743   :  { %3249 = vrcp.f32 %v625_v16 }
 0x750   :  { %v3250_v17 = vpop.eup %3249 }
 0x751   :  { %v627_v18 = vmul.f32 %v3250_v17, %v3248_v13 }
 0x753   :  { %2996 = vmatmul.mubr.msk.f32.vlgmr.msra.gmra.mxu1 %vm178_vm4, %v627_v18 }
 0x754   :  { %888 = vmatprep.mubr.f32.mxu1 %v3344_v1  ;;  %841 = vmatpush1.msra.mxu1 %v798_v28 }
 0x755   :  { %842 = vmatprep.subr.mxu1 %v797_v29 }
 0x756   :  { %843 = vmatpush1.msra.mxu1 %v796_v30 }
 0x757   :  { %844 = vmatprep.subr.mxu1 %v795_v31 }
 0x758   :  { %845 = vmatpush1.msra.mxu1 %v794_v32  ;;  %v807_v32 = vld [vmem:[%s4125_s4 + $0x78] sm:$0xff] }
 0x759   :  { %846 = vmatprep.subr.mxu1 %v793_v34  ;;  %v806_v34 = vld [vmem:[%s4125_s4 + $0x70] sm:$0xff] }
 0x75a   :  { %847 = vmatpush1.msra.mxu1 %v792_v37  ;;  %v805_v37 = vld [vmem:[%s4125_s4 + $0x68] sm:$0xff] }
 0x75b   :  { %848 = vmatprep.subr.mxu1 %v791_v38  ;;  %v804_v38 = vld [vmem:[%s4125_s4 + $0x60] sm:$0xff] }
 0x75c   :  { %849 = vmatpush1.msra.mxu1 %v790_v39  ;;  %v803_v39 = vld [vmem:[%s4125_s4 + $0x58] sm:$0xff] }
 0x75d   :  { %850 = vmatprep.subr.mxu1 %v789_v40  ;;  %v802_v40 = vld [vmem:[%s4125_s4 + $0x50] sm:$0xff] }
 0x75e   :  { %851 = vmatpush1.msra.mxu1 %v788_v42  ;;  %v801_v42 = vld [vmem:[%s4125_s4 + $0x48] sm:$0xff] }
 0x75f   :  { %852 = vmatprep.subr.mxu1 %v787_v43  ;;  %v800_v43 = vld [vmem:[%s4125_s4 + $0x40] sm:$0xff] }
 0x760   :  { %853 = vmatpush1.msra.mxu1 %v786_v49  ;;  %v1314_v49 = vld [vmem:[%s4124_s3 + $0x158] sm:$0xff] }
 0x761   :  { %854 = vmatprep.subr.mxu1 %v785_v51  ;;  %v1313_v51 = vld [vmem:[%s4124_s3 + $0x150] sm:$0xff] }
 0x762   :  { %855 = vmatpush1.msra.mxu1 %v784_v52  ;;  %v1312_v52 = vld [vmem:[%s4124_s3 + $0x148] sm:$0xff] }
 0x763   :  { %3022 = vmatprep.subr.mxu1 %v3344_v1 }
 0x813   :  { %v701_v44 = vpop.f32.mrf.mxu1 }
 0x814   :  { %706 = vrot.lane.b32.xlu1 %v701_v44, %s3347_s16  ;;  %v1318_v44 = vld [vmem:[%s4124_s3 + $0x178] sm:$0xff] }
 0x815   :  { %v2997_v45 = vpop.f32.mrf.mxu1 }
 0x816   :  { %v1317_v45 = vld [vmem:[%s4124_s3 + $0x170] sm:$0xff] }
 0x886   :  { %v707_v46 = vpop.permute.xlu1 %706 }
 0x887   :  { %v709_v47 = vsel %vm379_vm6, %v3595_v2, %v707_v46  ;;  %v1316_v46 = vld [vmem:[%s4124_s3 + $0x168] sm:$0xff] }
 0x888   :  { %3015 = vmatmul.mubr.msk.f32.vlgmr.msra.gmra.mxu0 %vm300_vm5, %v709_v47  ;;  %v1315_v47 = vld [vmem:[%s4124_s3 + $0x160] sm:$0xff] }
 0x889   :  { %3019 = vmatprep.mubr.msk.f32.mxu0 %vm3345_vm1, %v3344_v1 }
 0x948   :  { %v780_v54 = vpop.f32.mrf.mxu0 }
 0x949   :  { %v781_v55 = vadd.f32 %v780_v54, %v710_v53  ;;  %v1311_v53 = vld [vmem:[%s4124_s3 + $0x140] sm:$0xff] }
 0x94a   :  { %v3016_v56 = vpop.f32.mrf.mxu0 }
 0x94b   :  { %2840 = vmatmul.mubr.msk.f32.vlgmr.msra.gmra.mxu1 %vm300_vm5, %v781_v55  ;;  %v1310_v55 = vld [vmem:[%s4124_s3 + $0x138] sm:$0xff]  ;;  %v1309_v56 = vld [vmem:[%s4124_s3 + $0x130] sm:$0xff] }
 0x94c   :  { %3024 = vmatprep.mubr.msk.f32.mxu1 %vm3345_vm1, %v3344_v1 }
 0xa0b   :  { %v890_v60 = vpop.f32.mrf.mxu1 }
 0xa0c   :  { %v891_v61 = vadd.f32 %v890_v60, %v814_v58  ;;  %v1308_v58 = vld [vmem:[%s4124_s3 + $0x128] sm:$0xff]  ;;  %v1306_v60 = vld [vmem:[%s4124_s3 + $0x118] sm:$0xff] }
 0xa0d   :  { %v892_v62 = vpop.f32.mrf.mxu1 }
 0xa0e   :  { %v893_v63 = vadd.f32 %v892_v62, %v818_v59  ;;  %897 = vrot.lane.b32.xlu0 %v891_v61, %s3346_s15  ;;  %v895_v0 = vmul.f32 0.17677669, %v891_v61  ;;  %v1307_v59 = vld [vmem:[%s4124_s3 + $0x120] sm:$0xff] }
 0xa10   :  { %3023 = vmatpush3.msra.mxu1 %v893_v63 }
 0xa11   :  { %3032 = vmatprep.subr.mxu1 %v3344_v1 }
 0xa12   :  { %1060 = vrot.lane.b32.xlu0 %v891_v61, %s3347_s16 }
 0xa16   :  { %1058 = vrot.lane.b32.xlu0 %v895_v0, %s3349_s17 }
 0xa80   :  { %v898_v2 = vpop.permute.xlu0 %897 }
 0xa81   :  { %3018 = vmatpush3.xpose.msk.msra.mxu0 %vm379_vm6, %v898_v2  ;;  %v1305_v2 = vld [vmem:[%s4124_s3 + $0x110] sm:$0xff] }
 0xa82   :  { %3027 = vmatprep.subr.mxu0 %v3344_v1 }
 0xa84   :  { %v1061_v3 = vpop.permute.xlu0 %1060  ;;  %3020 = vmatmul.mubr.msk.f32.vlgmr.msra.gmra.mxu0 %vm379_vm6, %v895_v0 }
 0xa85   :  { %3028 = vmatpush3.xpose.msk.msra.mxu0 %vm379_vm6, %v1061_v3  ;;  %3029 = vmatprep.mubr.msk.f32.mxu0 %vm3345_vm1, %v3344_v1  ;;  %v1304_v3 = vld [vmem:[%s4124_s3 + $0x108] sm:$0xff] }
 0xa86   :  { %3037 = vmatprep.subr.mxu0 %v3344_v1 }
 0xa88   :  { %v1059_v4 = vpop.permute.xlu0 %1058 }
 0xa89   :  { %3030 = vmatmul.mubr.msk.f32.vlgmr.msra.gmra.mxu0 %vm379_vm6, %v1059_v4  ;;  %v1303_v4 = vld [vmem:[%s4124_s3 + $0x100] sm:$0xff] }
 0xa8a   :  { %3053 = vmatprep.mubr.msk.f32.mxu0 %vm3345_vm1, %v3344_v1  ;;  %3038 = vmatpush3.msra.mxu0 %v807_v32 }
 0xa8b   :  { %3039 = vmatprep.subr.mxu0 %v3344_v1 }
 0xa8c   :  { %3040 = vmatpush3.msra.mxu0 %v806_v34 }
 0xa8d   :  { %3041 = vmatprep.subr.mxu0 %v3344_v1 }
 0xa8e   :  { %3042 = vmatpush3.msra.mxu0 %v805_v37 }
 0xa8f   :  { %3043 = vmatprep.subr.mxu0 %v3344_v1 }
 0xa90   :  { %3044 = vmatpush3.msra.mxu0 %v804_v38 }
 0xa91   :  { %3045 = vmatprep.subr.mxu0 %v3344_v1 }
 0xa92   :  { %3046 = vmatpush3.msra.mxu0 %v803_v39 }
 0xa93   :  { %3047 = vmatprep.subr.mxu0 %v3344_v1 }
 0xa94   :  { %3048 = vmatpush3.msra.mxu0 %v802_v40 }
 0xa95   :  { %3049 = vmatprep.subr.mxu0 %v3344_v1 }
 0xa96   :  { %3050 = vmatpush3.msra.mxu0 %v801_v42 }
 0xa97   :  { %3051 = vmatprep.subr.mxu0 %v3344_v1 }
 0xa98   :  { %3052 = vmatpush3.msra.mxu0 %v800_v43 }
 0xa99   :  { %3056 = vmatprep.subr.mxu0 %v3344_v1 }
 0xb44   :  { %v970_v5 = vpop.f32.mrf.mxu0 }
 0xb45   :  { %v971_v6 = vadd.f32 %v970_v5, %v3581_v50  ;;  %v1229_v5 = vld [vmem:[#allocation4 + $0x5] ss:$0 sm:$0xff] }
 0xb46   :  { %v3021_v7 = vpop.f32.mrf.mxu0 }
 0xb47   :  { %v974_v8 = vsel %vm178_vm4, %v971_v6, -inf }
 0xb48   :  { %975 = vmax.xlane.f32.xlu0 %v974_v8 }
 0xb49   :  { %v1132_v10 = vpop.f32.mrf.mxu0 }
 0xb4a   :  { %v1133_v11 = vadd.f32 %v1132_v10, %v3581_v50  ;;  %v1328_v10 = vld [vmem:[#allocation4 + $0x3] ss:$8 sm:$0x3] }
 0xb4b   :  { %v3031_v12 = vpop.f32.mrf.mxu0 }
 0xb4c   :  { %v1136_v13 = vsel %vm178_vm4, %v1133_v11, -inf  ;;  %v1337_v12 = vrot.slane %v1328_v10, %v3568_v41 }
 0xb4d   :  { %1137 = vmax.xlane.f32.xlu1 %v1136_v13 }
 0xb5e   :  { %1148 = vrot.lane.b32.xlu1 %v893_v63, %s3349_s17 }
 0xbd1   :  { %v976_v14 = vpop.xlane.xlu0 %975 }
 0xbd2   :  { %v977_v16 = vsub.f32 %v971_v6, %v976_v14 }
 0xbd4   :  { %v978_v17 = vmul.f32 1.442695, %v977_v16 }
 0xbd6   :  { %3251 = vpow2.f32 %v978_v17  ;;  %v1138_v18 = vpop.xlane.xlu1 %1137 }
 0xbd7   :  { %v1139_v19 = vsub.f32 %v1133_v11, %v1138_v18  ;;  %v1333_v11 = vrot.slane %v1328_v10, %v3562_v36 }
 0xbd9   :  { %v1140_v20 = vmul.f32 1.442695, %v1139_v19 }
 0xbda   :  { %v1149_v29 = vpop.permute.xlu1 %1148 }
 0xbdb   :  { %3253 = vpow2.f32 %v1140_v20 }
 0xbe3   :  { %v3252_v21 = vpop.eup %3251 }
 0xbe4   :  { %v980_v22 = vsel %vm178_vm4, %v3252_v21, 0.0 }
 0xbe5   :  { %981 = vadd.xlane.f32.xlu0 %v980_v22 }
 0xbe8   :  { %v3254_v23 = vpop.eup %3253 }
 0xbe9   :  { %v1142_v24 = vsel %vm178_vm4, %v3254_v23, 0.0 }
 0xbea   :  { %1143 = vadd.xlane.f32.xlu0 %v1142_v24 }
 0xc6e   :  { %v982_v25 = vpop.xlane.xlu0 %981 }
 0xc6f   :  { %3255 = vrcp.f32 %v982_v25 }
 0xc73   :  { %v1144_v26 = vpop.xlane.xlu0 %1143 }
 0xc74   :  { %3257 = vrcp.f32 %v1144_v26 }
 0xc7c   :  { %v3256_v27 = vpop.eup %3255 }
 0xc7d   :  { %v984_v28 = vmul.f32 %v3256_v27, %v3252_v21 }
 0xc7f   :  { %3025 = vmatmul.mubr.msk.f32.vlgmr.msra.gmra.mxu1 %vm178_vm4, %v984_v28 }
 0xc80   :  { %3033 = vmatpush3.msra.mxu1 %v1149_v29  ;;  %3034 = vmatprep.mubr.msk.f32.mxu1 %vm3345_vm1, %v3344_v1 }
 0xc81   :  { %v3258_v30 = vpop.eup %3257  ;;  %1359 = vmatprep.subr.mxu1 %v1318_v44 }
 0xc82   :  { %v1146_v31 = vmul.f32 %v3258_v30, %v3254_v23 }
 0xc84   :  { %3035 = vmatmul.mubr.msk.f32.vlgmr.msra.gmra.mxu1 %vm178_vm4, %v1146_v31 }
 0xc85   :  { %1407 = vmatprep.mubr.f32.mxu1 %v3344_v1  ;;  %1360 = vmatpush1.msra.mxu1 %v1317_v45 }
 0xc86   :  { %1361 = vmatprep.subr.mxu1 %v1316_v46 }
 0xc87   :  { %1362 = vmatpush1.msra.mxu1 %v1315_v47 }
 0xc88   :  { %1363 = vmatprep.subr.mxu1 %v1314_v49 }
 0xc89   :  { %1364 = vmatpush1.msra.mxu1 %v1313_v51 }
 0xc8a   :  { %1365 = vmatprep.subr.mxu1 %v1312_v52  ;;  %v1326_v52 = vld [vmem:[%s4125_s4 + $0xb8] sm:$0xff] }
 0xc8b   :  { %1366 = vmatpush1.msra.mxu1 %v1311_v53  ;;  %v1325_v53 = vld [vmem:[%s4125_s4 + $0xb0] sm:$0xff] }
 0xc8c   :  { %1367 = vmatprep.subr.mxu1 %v1310_v55  ;;  %v1323_v55 = vld [vmem:[%s4125_s4 + $0xa0] sm:$0xff] }
 0xc8d   :  { %1368 = vmatpush1.msra.mxu1 %v1309_v56  ;;  %v1322_v56 = vld [vmem:[%s4125_s4 + $0x98] sm:$0xff] }
 0xc8e   :  { %1369 = vmatprep.subr.mxu1 %v1308_v58  ;;  %v1320_v58 = vld [vmem:[%s4125_s4 + $0x88] sm:$0xff] }
 0xc8f   :  { %1370 = vmatpush1.msra.mxu1 %v1307_v59  ;;  %v1319_v59 = vld [vmem:[%s4125_s4 + $0x80] sm:$0xff] }
 0xc90   :  { %1371 = vmatprep.subr.mxu1 %v1306_v60 }
 0xc91   :  { %1372 = vmatpush1.msra.mxu1 %v1305_v2 }
 0xc92   :  { %1373 = vmatprep.subr.mxu1 %v1304_v3  ;;  %v1748_v3 = vld [vmem:[#allocation4 + $0x6] ss:$0 sm:$0xff] }
 0xc93   :  { %1374 = vmatpush1.msra.mxu1 %v1303_v4 }
 0xc94   :  { %3061 = vmatprep.subr.mxu1 %v3344_v1 }
 0xd3f   :  { %v1054_v54 = vpop.f32.mrf.mxu1 }
 0xd41   :  { %v3026_v57 = vpop.f32.mrf.mxu1 }
 0xd42   :  { %v1321_v57 = vld [vmem:[%s4125_s4 + $0x90] sm:$0xff] }
 0xd44   :  { %v1220_v61 = vpop.f32.mrf.mxu1 }
 0xd45   :  { %1225 = vrot.lane.b32.xlu0 %v1220_v61, %s3347_s16 }
 0xd46   :  { %v3036_v62 = vpop.f32.mrf.mxu1 }
 0xdb7   :  { %v1226_v63 = vpop.permute.xlu0 %1225 }
 0xdb8   :  { %v1228_v0 = vsel %vm379_vm6, %v1054_v54, %v1226_v63  ;;  %v1324_v54 = vld [vmem:[%s4125_s4 + $0xa8] sm:$0xff] }
 0xdb9   :  { %3054 = vmatmul.mubr.msk.f32.vlgmr.msra.gmra.mxu0 %vm300_vm5, %v1228_v0 }
 0xdba   :  { %3058 = vmatprep.mubr.msk.f32.mxu0 %vm3345_vm1, %v3344_v1 }
 0xe79   :  { %v1299_v6 = vpop.f32.mrf.mxu0 }
 0xe7a   :  { %v1300_v7 = vadd.f32 %v1299_v6, %v1229_v5 }
 0xe7b   :  { %v3055_v8 = vpop.f32.mrf.mxu0 }
 0xe7c   :  { %2848 = vmatmul.mubr.msk.f32.vlgmr.msra.gmra.mxu1 %vm300_vm5, %v1300_v7 }
 0xe7d   :  { %3063 = vmatprep.mubr.msk.f32.mxu1 %vm3345_vm1, %v3344_v1 }
 0xf3c   :  { %v1409_v13 = vpop.f32.mrf.mxu1 }
 0xf3d   :  { %v1410_v14 = vadd.f32 %v1409_v13, %v1333_v11  ;;  %v163_v11 = vand.u32 3, %v3559_v35  ;;  %v2022_v35 = vld [vmem:[#allocation2 + $0x90] sm:$0xff] }
 0xf3e   :  { %v1411_v16 = vpop.f32.mrf.mxu1 }
 0xf3f   :  { %v1412_v17 = vadd.f32 %v1411_v16, %v1337_v12  ;;  %1416 = vrot.lane.b32.xlu1 %v1410_v14, %s3346_s15  ;;  %v1414_v18 = vmul.f32 0.17677669, %v1410_v14  ;;  %vm1904_vm8 = vcmp.eq.s32.totalorder %v163_v11, %v3490_v9 }
 0xf41   :  { %3062 = vmatpush3.msra.mxu1 %v1412_v17  ;;  %1577 = vrot.lane.b32.xlu0 %v1414_v18, %s3349_s17 }
 0xf42   :  { %3071 = vmatprep.subr.mxu1 %v3344_v1 }
 0xf43   :  { %1579 = vrot.lane.b32.xlu1 %v1410_v14, %s3347_s16 }
 0xfb1   :  { %v1417_v19 = vpop.permute.xlu1 %1416 }
 0xfb2   :  { %3057 = vmatpush3.xpose.msk.msra.mxu0 %vm379_vm6, %v1417_v19  ;;  %v164_v19 = vshra.s32 %v3490_v9, 3  ;;  %v2023_v9 = vld [vmem:[#allocation2 + $0x98] sm:$0xff] }
 0xfb3   :  { %3066 = vmatprep.subr.mxu0 %v3344_v1  ;;  %v1578_v21 = vpop.permute.xlu0 %1577 }
 0xfb4   :  { %vm165_vm11 = vcmp.eq.s32.totalorder %v163_v11, %v164_v19 }
 0xfb5   :  { %v1580_v20 = vpop.permute.xlu1 %1579  ;;  %3059 = vmatmul.mubr.msk.f32.vlgmr.msra.gmra.mxu0 %vm379_vm6, %v1414_v18 }
 0xfb6   :  { %3067 = vmatpush3.xpose.msk.msra.mxu0 %vm379_vm6, %v1580_v20  ;;  %3068 = vmatprep.mubr.msk.f32.mxu0 %vm3345_vm1, %v3344_v1 }
 0xfb7   :  { %3076 = vmatprep.subr.mxu0 %v3344_v1 }
 0xfb9   :  { %3069 = vmatmul.mubr.msk.f32.vlgmr.msra.gmra.mxu0 %vm379_vm6, %v1578_v21 }
 0xfba   :  { %3092 = vmatprep.mubr.msk.f32.mxu0 %vm3345_vm1, %v3344_v1  ;;  %3077 = vmatpush3.msra.mxu0 %v1326_v52  ;;  %v2006_v52 = vld [vmem:[#allocation2 + $0x10] sm:$0xff] }
 0xfbb   :  { %3078 = vmatprep.subr.mxu0 %v3344_v1 }
 0xfbc   :  { %3079 = vmatpush3.msra.mxu0 %v1325_v53  ;;  %v2005_v53 = vld [vmem:[#allocation2 + $0x8] sm:$0xff] }
 0xfbd   :  { %3080 = vmatprep.subr.mxu0 %v3344_v1 }
 0xfbe   :  { %3081 = vmatpush3.msra.mxu0 %v1324_v54  ;;  %v2004_v54 = vld [vmem:[#allocation2] sm:$0xff] }
 0xfbf   :  { %3082 = vmatprep.subr.mxu0 %v3344_v1 }
 0xfc0   :  { %3083 = vmatpush3.msra.mxu0 %v1323_v55 }
 0xfc1   :  { %3084 = vmatprep.subr.mxu0 %v3344_v1 }
 0xfc2   :  { %3085 = vmatpush3.msra.mxu0 %v1322_v56 }
 0xfc3   :  { %3086 = vmatprep.subr.mxu0 %v3344_v1 }
 0xfc4   :  { %3087 = vmatpush3.msra.mxu0 %v1321_v57 }
 0xfc5   :  { %3088 = vmatprep.subr.mxu0 %v3344_v1 }
 0xfc6   :  { %3089 = vmatpush3.msra.mxu0 %v1320_v58 }
 0xfc7   :  { %3090 = vmatprep.subr.mxu0 %v3344_v1 }
 0xfc8   :  { %3091 = vmatpush3.msra.mxu0 %v1319_v59 }
 0xfc9   :  { %3105 = vmatprep.subr.mxu0 %v3344_v1 }
0x1075   :  { %v1489_v22 = vpop.f32.mrf.mxu0 }
0x1076   :  { %v1490_v23 = vadd.f32 %v1489_v22, %v3581_v50 }
0x1077   :  { %v3060_v24 = vpop.f32.mrf.mxu0 }
0x1078   :  { %v1493_v25 = vsel %vm178_vm4, %v1490_v23, -inf }
0x1079   :  { %1494 = vmax.xlane.f32.xlu1 %v1493_v25  ;;  %v1651_v26 = vpop.f32.mrf.mxu0 }
0x107a   :  { %v1652_v27 = vadd.f32 %v1651_v26, %v3581_v50 }
0x107b   :  { %v3070_v28 = vpop.f32.mrf.mxu0 }
0x107c   :  { %v1655_v29 = vsel %vm178_vm4, %v1652_v27, -inf  ;;  %v2858_v28 = vsel %vm1910_vm13, 1.0, %v3344_v1  ;;  %vm2539_vm13 = vcmask 392192  }
0x107d   :  { %1656 = vmax.xlane.f32.xlu0 %v1655_v29 }
0x1102   :  { %v1495_v30 = vpop.xlane.xlu1 %1494 }
0x1103   :  { %v1496_v31 = vsub.f32 %v1490_v23, %v1495_v30  ;;  %v2830_v23 = vsel %vm165_vm11, 1.0, %v3344_v1  ;;  %v2026_v30 = vld [vmem:[#allocation2 + $0xb0] sm:$0xff]  ;;  %vm2401_vm11 = vcmask 845600  }
0x1105   :  { %v1497_v32 = vmul.f32 1.442695, %v1496_v31  ;;  %v2025_v31 = vld [vmem:[#allocation2 + $0xa8] sm:$0xff] }
0x1106   :  { %v1657_v34 = vpop.xlane.xlu0 %1656 }
0x1107   :  { %3259 = vpow2.f32 %v1497_v32  ;;  %v1658_v37 = vsub.f32 %v1652_v27, %v1657_v34  ;;  %v2024_v32 = vld [vmem:[#allocation2 + $0xa0] sm:$0xff] }
0x1108   :  { %v2020_v34 = vld [vmem:[#allocation2 + $0x80] sm:$0xff] }
0x1109   :  { %v1659_v38 = vmul.f32 1.442695, %v1658_v37  ;;  %v2019_v37 = vld [vmem:[#allocation2 + $0x78] sm:$0xff] }
0x110b   :  { %3261 = vpow2.f32 %v1659_v38  ;;  %v2018_v38 = vld [vmem:[#allocation2 + $0x70] sm:$0xff] }
0x1114   :  { %v3260_v39 = vpop.eup %3259 }
0x1115   :  { %v1499_v40 = vsel %vm178_vm4, %v3260_v39, 0.0 }
0x1116   :  { %1500 = vadd.xlane.f32.xlu0 %v1499_v40  ;;  %v2016_v40 = vld [vmem:[#allocation2 + $0x60] sm:$0xff] }
0x1118   :  { %v3262_v42 = vpop.eup %3261 }
0x1119   :  { %v1661_v43 = vsel %vm178_vm4, %v3262_v42, 0.0 }
0x111a   :  { %1662 = vadd.xlane.f32.xlu1 %v1661_v43  ;;  %v2014_v43 = vld [vmem:[#allocation2 + $0x50] sm:$0xff] }
0x112c   :  { %1667 = vrot.lane.b32.xlu0 %v1412_v17, %s3349_s17 }
0x119f   :  { %v1501_v50 = vpop.xlane.xlu0 %1500 }
0x11a0   :  { %3263 = vrcp.f32 %v1501_v50  ;;  %v2013_v50 = vld [vmem:[#allocation2 + $0x48] sm:$0xff] }
0x11a3   :  { %v1663_v44 = vpop.xlane.xlu1 %1662  ;;  %v1668_v47 = vpop.permute.xlu0 %1667 }
0x11a4   :  { %3265 = vrcp.f32 %v1663_v44  ;;  %v2012_v44 = vld [vmem:[#allocation2 + $0x40] sm:$0xff] }
0x11ad   :  { %v3264_v45 = vpop.eup %3263 }
0x11ae   :  { %v1503_v46 = vmul.f32 %v3264_v45, %v3260_v39  ;;  %v2017_v39 = vld [vmem:[#allocation2 + $0x68] sm:$0xff]  ;;  %v2011_v45 = vld [vmem:[#allocation2 + $0x38] sm:$0xff] }
0x11b0   :  { %3064 = vmatmul.mubr.msk.f32.vlgmr.msra.gmra.mxu1 %vm178_vm4, %v1503_v46  ;;  %v2010_v46 = vld [vmem:[#allocation2 + $0x30] sm:$0xff] }
0x11b1   :  { %v3266_v49 = vpop.eup %3265  ;;  %3072 = vmatpush3.msra.mxu1 %v1668_v47  ;;  %3073 = vmatprep.mubr.msk.f32.mxu1 %vm3345_vm1, %v3344_v1  ;;  %v2009_v47 = vld [vmem:[#allocation2 + $0x28] sm:$0xff] }
0x11b2   :  { %v1665_v51 = vmul.f32 %v3266_v49, %v3262_v42  ;;  %3095 = vmatprep.subr.mxu1 %v3344_v1  ;;  %v2015_v42 = vld [vmem:[#allocation2 + $0x58] sm:$0xff]  ;;  %v2008_v49 = vld [vmem:[#allocation2 + $0x20] sm:$0xff] }
0x11b4   :  { %3074 = vmatmul.mubr.msk.f32.vlgmr.msra.gmra.mxu1 %vm178_vm4, %v1665_v51  ;;  %v2007_v51 = vld [vmem:[#allocation2 + $0x18] sm:$0xff] }
0x11b5   :  { %3097 = vmatprep.mubr.msk.f32.mxu1 %vm3345_vm1, %v3344_v1 }
0x1270   :  { %v1573_v60 = vpop.f32.mrf.mxu1 }
0x1272   :  { %v3065_v61 = vpop.f32.mrf.mxu1 }
0x1273   :  { %v3919_v61 = vld [vmem:[#allocation4 + $0x7] ss:$8 sm:$0x3] }
0x1274   :  { %v1739_v62 = vpop.f32.mrf.mxu1 }
0x1275   :  { %1744 = vrot.lane.b32.xlu1 %v1739_v62, %s3347_s16  ;;  %v2038_v62 = vrot.slane %v3919_v61, %v3568_v41 }
0x1276   :  { %v3075_v63 = vpop.f32.mrf.mxu1 }
0x1279   :  { %1822 = vrot.lane.b32.xlu1 %v3553_v33, %s3346_s15  ;;  %v1827_v33 = vld [vmem:[%s4126_s5] sm:$0xf]  ;;  %s3352_s5 = smov 56  }
0x127a   :  { %3096 = vmatpush3.xpose.msk.msra.mxu1 %vm300_vm5, %v1827_v33 }
0x127b   :  { %3100 = vmatprep.subr.mxu1 %v3344_v1 }
0x127d   :  { %169 = vrot.lane.b32.xlu1 %v3505_v15, %s3350_s14 }
0x1281   :  { %172 = vrot.lane.b32.xlu1 %v3505_v15, %s3341_s25  ;;  %s3353_s25 = smov 60  }
0x1285   :  { %175 = vrot.lane.b32.xlu1 %v3505_v15, %s3351_s6 }
0x12e7   :  { %v1745_v0 = vpop.permute.xlu1 %1744 }
0x12e8   :  { %v1747_v2 = vsel %vm379_vm6, %v1573_v60, %v1745_v0 }
0x12e9   :  { %3093 = vmatmul.mubr.msk.f32.vlgmr.msra.gmra.mxu0 %vm300_vm5, %v1747_v2 }
0x12ea   :  { %3129 = vmatprep.mubr.msk.f32.mxu0 %vm3345_vm1, %v3344_v1 }
0x12eb   :  { %v1823_v6 = vpop.permute.xlu1 %1822 }
0x12ef   :  { %v170_v17 = vpop.permute.xlu1 %169 }
0x12f0   :  { %v179_v21 = vsel %vm178_vm4, %v3505_v15, %v170_v17  ;;  %v2027_v15 = vld [vmem:[#allocation2 + $0xb8] sm:$0xff] }
0x12f3   :  { %v173_v18 = vpop.permute.xlu1 %172 }
0x12f4   :  { %v181_v22 = vsel %vm180_vm10, %v179_v21, %v173_v18 }
0x12f7   :  { %v176_v20 = vpop.permute.xlu1 %175 }
0x12f8   :  { %v183_v24 = vsel %vm182_vm12, %v181_v22, %v176_v20  ;;  %vm2385_vm12 = vcmask 812800  }
0x12f9   :  { %v184_v25 = vmul.f32 %v2830_v23, %v183_v24  ;;  %v3354_v24 = vmov 74  }
0x12fa   :  { %3219 = vset.pattern.permute.xlu1 %v3354_v24  ;;  %v2298_v24 = vld [vmem:[%s4128_s7] sm:$0xff] }
0x12fb   :  { %v1913_v26 = vsel %vm379_vm6, %v184_v25, %v176_v20  ;;  %v3355_v25 = vmov 73  }
0x12fc   :  { %3218 = vset.pattern.permute.xlu0 %v3355_v25 }
0x13a9   :  { %v1818_v4 = vpop.f32.mrf.mxu0 }
0x13aa   :  { %v1819_v5 = vadd.f32 %v1818_v4, %v1748_v3 }
0x13ab   :  { %v3094_v7 = vpop.f32.mrf.mxu0 }
0x13ac   :  { %v1825_v8 = vadd.f32 %v1823_v6, %v1819_v5 }
0x13ae   :  { %v1826_v10 = vmax.f32 %v1825_v8, 0.0 }
0x13b0   :  { %3098 = vmatmul.mubr.msk.f32.vlgmr.msra.gmra.mxu1 %vm300_vm5, %v1826_v10 }
0x13b1   :  { %3102 = vmatprep.mubr.msk.f32.mxu1 %vm3345_vm1, %v3344_v1 }
0x1470   :  { %v1900_v12 = vpop.f32.mrf.mxu1 }
0x1471   :  { %v1905_v13 = vsel %vm1904_vm8, %v1900_v12, 0.0  ;;  %vm2129_vm8 = vcmask 25600  }
0x1472   :  { %v3099_v14 = vpop.f32.mrf.mxu1  ;;  %v1907_v16 = vsel %vm1906_vm9, %v1905_v13, 0.0  ;;  %vm2417_vm9 = vcmask 862016  }
0x1473   :  { %1908 = vadd.xlane.f32.xlu0 %v1907_v16 }
0x14fc   :  { %v1909_v27 = vpop.xlane.xlu0 %1908 }
0x14fd   :  { %v1915_v29 = vsel %vm1914_vm14, %v1913_v26, %v1909_v27  ;;  %vm2634_vm14 = vcmask 162816  }
0x14fe   :  { %3101 = vmatpush3.msra.mxu1 %v1915_v29 }
0x14ff   :  { %3103 = vmatmul.mubr.msk.f32.vlgmr.msra.gmra.mxu1 %vm178_vm4, %v2858_v28  ;;  %2053 = vmatprep.subr.mxu1 %v2027_v15  ;;  %vm2118_vm4 = vcmask 550400  }
0x1500   :  { %2109 = vmatprep.mubr.f32.mxu1 %v3344_v1  ;;  %2054 = vmatpush1.msra.mxu1 %v2026_v30 }
0x1501   :  { %2055 = vmatprep.subr.mxu1 %v2025_v31 }
0x1502   :  { %2056 = vmatpush1.msra.mxu1 %v2024_v32  ;;  %v3356_v32 = vmov 69  }
0x1503   :  { %2057 = vmatprep.subr.mxu1 %v2023_v9  ;;  %v3357_v9 = vmov 71  }
0x1504   :  { %2058 = vmatpush1.msra.mxu1 %v2022_v35 }
0x1505   :  { %2059 = vmatprep.subr.mxu1 %v2021_v48 }
0x1506   :  { %2060 = vmatpush1.msra.mxu1 %v2020_v34  ;;  %v3358_v34 = vmov 75  }
0x1507   :  { %2061 = vmatprep.subr.mxu1 %v2019_v37  ;;  %v3359_v37 = vmov 65  }
0x1508   :  { %2062 = vmatpush1.msra.mxu1 %v2018_v38  ;;  %v3360_v38 = vmov 70  }
0x1509   :  { %2063 = vmatprep.subr.mxu1 %v2017_v39  ;;  %v3361_v39 = vmov 67  }
0x150a   :  { %2064 = vmatpush1.msra.mxu1 %v2016_v40  ;;  %v3362_v40 = vmov 77  }
0x150b   :  { %2065 = vmatprep.subr.mxu1 %v2015_v42  ;;  %v3363_v42 = vmov 66  }
0x150c   :  { %2066 = vmatpush1.msra.mxu1 %v2014_v43  ;;  %v3364_v43 = vmov 72  }
0x150d   :  { %2067 = vmatprep.subr.mxu1 %v2013_v50  ;;  %v3365_v50 = vmov 68  }
0x150e   :  { %2068 = vmatpush1.msra.mxu1 %v2012_v44  ;;  %v3366_v44 = vmov 76  }
0x150f   :  { %2069 = vmatprep.subr.mxu1 %v2011_v45  ;;  %v3367_v45 = vmov 64  }
0x1510   :  { %2070 = vmatpush1.msra.mxu1 %v2010_v46  ;;  %v2034_v46 = vrot.slane %v3919_v61, %v3562_v36 }
0x1511   :  { %2071 = vmatprep.subr.mxu1 %v2009_v47 }
0x1512   :  { %2072 = vmatpush1.msra.mxu1 %v2008_v49 }
0x1513   :  { %2073 = vmatprep.subr.mxu1 %v2007_v51 }
0x1514   :  { %2074 = vmatpush1.msra.mxu1 %v2006_v52 }
0x1515   :  { %2075 = vmatprep.subr.mxu1 %v2005_v53 }
0x1516   :  { %2076 = vmatpush1.msra.mxu1 %v2004_v54 }
0x1517   :  { %3132 = vmatprep.subr.mxu1 %v3344_v1 }
0x15bf   :  { %v3907_v55 = vpop.f32.mrf.mxu1 }
0x15c0   :  { %1996 = vrot.lane.b32.xlu1 %v3907_v55, %s3347_s16 }
0x15c1   :  { %v3104_v56 = vpop.f32.mrf.mxu1 }
0x15c4   :  { %1999 = vrot.lane.b32.xlu1 %v3907_v55, %s3346_s15 }
0x1632   :  { %v1997_v57 = vpop.permute.xlu1 %1996 }
0x1633   :  { %v2002_v58 = vsel %vm379_vm6, %v3907_v55, %v1997_v57 }
0x1636   :  { %v2000_v59 = vpop.permute.xlu1 %1999 }
0x1637   :  { %v2003_v60 = vsel %vm300_vm5, %v2002_v58, %v2000_v59 }
0x1638   :  { %2860 = vmatmul.mubr.msk.f32.vlgmr.msra.gmra.mxu1 %vm2041_vm15, %v2003_v60 }
0x1639   :  { %3144 = vmatprep.mubr.msk.f32.mxu1 %vm3345_vm1, %v3344_v1 }
0x16f8   :  { %v3923_v63 = vpop.f32.mrf.mxu1 }
0x16f9   :  { %v2112_v47 = vadd.f32 %v3923_v63, %v2034_v46 }
0x16fa   :  { %v2113_v0 = vpop.f32.mrf.mxu1 }
0x16fb   :  { %v3925_v2 = vadd.f32 %v2113_v0, %v2038_v62  ;;  %v3939_v49 = vmax.f32 %v2112_v47, 0.0 }
0x16fd   :  { %v2152_v33 = vsel %vm2151_vm2, %v3925_v2, -inf  ;;  %v2136_v3 = vsel %vm2135_vm3, %v3925_v2, -inf  ;;  %v2119_v4 = vsel %vm2118_vm4, %v3925_v2, -inf  ;;  %v3949_v60 = vmax.f32 %v3925_v2, 0.0 }
0x16fe   :  { %2153 = vmax.xlane.f32.xlu1 %v2152_v33  ;;  %2137 = vmax.xlane.f32.xlu0 %v2136_v3  ;;  %vm2723_vm2 = vcmask 211968   ;;  %vm2816_vm3 = vcmask 7168   ;;  %vm2819_vm4 = vcmask 148480  }
0x1702   :  { %2120 = vmax.xlane.f32.xlu0 %v2119_v4 }
0x1787   :  { %v2154_v5 = vpop.xlane.xlu1 %2153  ;;  %v2138_v6 = vpop.xlane.xlu0 %2137 }
0x1788   :  { %v2155_v41 = vsub.f32 %v3925_v2, %v2154_v5  ;;  %v2139_v7 = vsub.f32 %v3925_v2, %v2138_v6  ;;  %v2309_v6 = vld [vmem:[%s4128_s7 + $0x58] sm:$0xff] }
0x1789   :  { %3106 = vmatpush3.msra.mxu0 %v2309_v6 }
0x178a   :  { %v2156_v8 = vmul.f32 1.442695, %v2155_v41  ;;  %v2140_v10 = vmul.f32 1.442695, %v2139_v7  ;;  %v2308_v41 = vld [vmem:[%s4128_s7 + $0x50] sm:$0xff]  ;;  %3107 = vmatprep.subr.mxu0 %v3344_v1  ;;  %v2307_v7 = vld [vmem:[%s4128_s7 + $0x48] sm:$0xff] }
0x178b   :  { %v2121_v11 = vpop.xlane.xlu0 %2120  ;;  %3108 = vmatpush3.msra.mxu0 %v2308_v41 }
0x178c   :  { %3267 = vpow2.f32 %v2156_v8  ;;  %v2122_v12 = vsub.f32 %v3925_v2, %v2121_v11  ;;  %3109 = vmatprep.subr.mxu0 %v3344_v1  ;;  %v2306_v8 = vld [vmem:[%s4128_s7 + $0x40] sm:$0xff]  ;;  %v2304_v11 = vld [vmem:[%s4128_s7 + $0x30] sm:$0xff] }
0x178d   :  { %3269 = vpow2.f32 %v2140_v10  ;;  %3110 = vmatpush3.msra.mxu0 %v2307_v7  ;;  %v2305_v10 = vld [vmem:[%s4128_s7 + $0x38] sm:$0xff] }
0x178e   :  { %v2123_v13 = vmul.f32 1.442695, %v2122_v12  ;;  %3111 = vmatprep.subr.mxu0 %v3344_v1  ;;  %v2303_v12 = vld [vmem:[%s4128_s7 + $0x28] sm:$0xff] }
0x178f   :  { %3112 = vmatpush3.msra.mxu0 %v2306_v8 }
0x1790   :  { %3271 = vpow2.f32 %v2123_v13  ;;  %3113 = vmatprep.subr.mxu0 %v3344_v1  ;;  %v2302_v13 = vld [vmem:[%s4128_s7 + $0x20] sm:$0xff] }
0x1791   :  { %3114 = vmatpush3.msra.mxu0 %v2305_v10 }
0x1792   :  { %3115 = vmatprep.subr.mxu0 %v3344_v1 }
0x1793   :  { %3116 = vmatpush3.msra.mxu0 %v2304_v11 }
0x1794   :  { %3117 = vmatprep.subr.mxu0 %v3344_v1 }
0x1795   :  { %3118 = vmatpush3.msra.mxu0 %v2303_v12 }
0x1796   :  { %3119 = vmatprep.subr.mxu0 %v3344_v1 }
0x1797   :  { %3120 = vmatpush3.msra.mxu0 %v2302_v13 }
0x1798   :  { %3121 = vmatprep.subr.mxu0 %v3344_v1 }
0x1799   :  { %v3268_v14 = vpop.eup %3267 }
0x179a   :  { %v3270_v16 = vpop.eup %3269  ;;  %2159 = vrot.lane.b32.xlu0 %v3268_v14, %s3352_s5 }
0x179b   :  { %2143 = vrot.lane.b32.xlu1 %v3270_v16, %s3353_s25 }
0x179d   :  { %v3272_v17 = vpop.eup %3271 }
0x179f   :  { %2126 = vrot.lane.b32.xlu1 %v3272_v17, %s3346_s15 }
0x180c   :  { %v2160_v18 = vpop.permute.xlu0 %2159 }
0x180d   :  { %v2144_v19 = vpop.permute.xlu1 %2143  ;;  %v2163_v20 = vsel %vm2162_vm7, %v2160_v18, 0.0 }
0x180e   :  { %v2146_v21 = vsel %vm2129_vm8, %v2144_v19, 0.0  ;;  %2164 = vadd.xlane.f32.xlu0 %v2163_v20 }
0x180f   :  { %2147 = vadd.xlane.f32.xlu1 %v2146_v21 }
0x1811   :  { %v2127_v22 = vpop.permute.xlu1 %2126 }
0x1812   :  { %v2130_v23 = vsel %vm2129_vm8, %v2127_v22, 0.0  ;;  %v2299_v22 = vld [vmem:[%s4128_s7 + $0x8] sm:$0xff] }
0x1813   :  { %2131 = vadd.xlane.f32.xlu0 %v2130_v23 }
0x1897   :  { %v2165_v26 = vpop.xlane.xlu0 %2164 }
0x1898   :  { %v2148_v27 = vpop.xlane.xlu1 %2147  ;;  %3273 = vrcp.f32 %v2165_v26 }
0x1899   :  { %3275 = vrcp.f32 %v2148_v27 }
0x189c   :  { %v2132_v28 = vpop.xlane.xlu0 %2131 }
0x189d   :  { %3277 = vrcp.f32 %v2132_v28 }
0x18a5   :  { %v3274_v29 = vpop.eup %3273 }
0x18a6   :  { %v2167_v15 = vmul.f32 %v3274_v29, %v3268_v14  ;;  %v3276_v30 = vpop.eup %3275  ;;  %v2301_v14 = vld [vmem:[%s4128_s7 + $0x18] sm:$0xff] }
0x18a7   :  { %v2150_v31 = vmul.f32 %v3276_v30, %v3270_v16  ;;  %v2300_v16 = vld [vmem:[%s4128_s7 + $0x10] sm:$0xff]  ;;  %3122 = vmatpush3.msra.mxu0 %v2301_v14  ;;  %s3368_s7 = smov 28  }
0x18a8   :  { %2253 = vperm.xlu1 %3219, %v2167_v15   ;;  %2243 = vperm.xlu0 %3218, %v2167_v15  }
0x18a9   :  { %3123 = vmatprep.subr.mxu0 %v3344_v1 }
0x18aa   :  { %v3278_v35 = vpop.eup %3277  ;;  %3124 = vmatpush3.msra.mxu0 %v2300_v16  ;;  %v3369_v16 = vmov 102  }
0x18ab   :  { %v2134_v48 = vmul.f32 %v3278_v35, %v3272_v17  ;;  %3125 = vmatprep.subr.mxu0 %v3344_v1 }
0x18ac   :  { %3220 = vset.pattern.permute.xlu1 %v3356_v32  ;;  %3223 = vset.pattern.permute.xlu0 %v3357_v9 }
0x18ad   :  { %2207 = vperm.xlu1 %3220, %v2150_v31   ;;  %2227 = vperm.xlu0 %3223, %v2150_v31  }
0x18ae   :  { %3126 = vmatpush3.msra.mxu0 %v2299_v22 }
0x18af   :  { %3127 = vmatprep.subr.mxu0 %v3344_v1 }
0x18b0   :  { %3128 = vmatpush3.msra.mxu0 %v2298_v24 }
0x18b1   :  { %3221 = vset.pattern.permute.xlu1 %v3358_v34  ;;  %3226 = vset.pattern.permute.xlu0 %v3359_v37 }
0x18b2   :  { %2263 = vperm.xlu1 %3221, %v2167_v15   ;;  %2175 = vperm.xlu0 %3226, %v2134_v48  }
0x18b3   :  { %3147 = vmatprep.subr.mxu0 %v3344_v1 }
0x18b6   :  { %3222 = vset.pattern.permute.xlu1 %v3360_v38  ;;  %3229 = vset.pattern.permute.xlu0 %v3361_v39 }
0x18b7   :  { %2217 = vperm.xlu1 %3222, %v2150_v31   ;;  %2191 = vperm.xlu0 %3229, %v2134_v48  }
0x18bb   :  { %3224 = vset.pattern.permute.xlu1 %v3362_v40  ;;  %3231 = vset.pattern.permute.xlu0 %v3363_v42 }
0x18bc   :  { %2279 = vperm.xlu1 %3224, %v2167_v15  }
0x18c0   :  { %3225 = vset.pattern.permute.xlu1 %v3364_v43 }
0x18c1   :  { %2238 = vperm.xlu1 %3225, %v2167_v15  }
0x18c5   :  { %3227 = vset.pattern.permute.xlu1 %v3365_v50 }
0x18c6   :  { %2202 = vperm.xlu1 %3227, %v2150_v31  }
0x18ca   :  { %3228 = vset.pattern.permute.xlu1 %v3366_v44 }
0x18cb   :  { %2273 = vperm.xlu1 %3228, %v2167_v15  }
0x18cf   :  { %3230 = vset.pattern.permute.xlu1 %v3367_v45 }
0x1923   :  { %v2254_v51 = vpop.permute.xlu1 %2253  ;;  %v2244_v52 = vpop.permute.xlu0 %2243 }
0x1924   :  { %v2246_v53 = vmul.f32 %v2244_v52, %v3939_v49  ;;  %v2256_v54 = vmul.f32 %v2254_v51, %v3939_v49 }
0x1926   :  { %2248 = vrot.lane.b32.xlu1 %v2246_v53, %s3349_s17 }
0x1928   :  { %v2208_v56 = vpop.permute.xlu1 %2207  ;;  %v2228_v59 = vpop.permute.xlu0 %2227 }
0x1929   :  { %v2210_v57 = vmul.f32 %v2208_v56, %v3939_v49  ;;  %v2230_v61 = vmul.f32 %v2228_v59, %v3949_v60  ;;  %v2310_v56 = vld [vmem:[#allocation4 + $0x10] ss:$0 sm:$0xff] }
0x192a   :  { %2258 = vrot.lane.b32.xlu1 %v2256_v54, %s3346_s15 }
0x192b   :  { %2212 = vrot.lane.b32.xlu0 %v2210_v57, %s3349_s17 }
0x192d   :  { %v2264_v36 = vpop.permute.xlu1 %2263  ;;  %v2176_v0 = vpop.permute.xlu0 %2175 }
0x192e   :  { %v2266_v58 = vmul.f32 %v2264_v36, %v3939_v49  ;;  %v2178_v4 = vmul.f32 %v2176_v0, %v3939_v49 }
0x1930   :  { %2268 = vrot.lane.b32.xlu1 %v2266_v58, %s3347_s16 }
0x1932   :  { %v2218_v62 = vpop.permute.xlu1 %2217  ;;  %v2192_v2 = vpop.permute.xlu0 %2191 }
0x1933   :  { %v2220_v63 = vmul.f32 %v2218_v62, %v3949_v60  ;;  %v2194_v5 = vmul.f32 %v2192_v2, %v3949_v60 }
0x1934   :  { %2232 = vrot.lane.b32.xlu1 %v2230_v61, %s3347_s16 }
0x1935   :  { %2222 = vrot.lane.b32.xlu0 %v2220_v63, %s3346_s15 }
0x1937   :  { %v2280_v33 = vpop.permute.xlu1 %2279 }
0x1938   :  { %v2282_v3 = vmul.f32 %v2280_v33, %v3949_v60  ;;  %2170 = vperm.xlu1 %3230, %v2134_v48  }
0x193a   :  { %2284 = vrot.lane.b32.xlu0 %v2282_v3, %s3349_s17 }
0x193c   :  { %2180 = vrot.lane.b32.xlu1 %v2178_v4, %s3349_s17  ;;  %v2239_v17 = vpop.permute.xlu1 %2238 }
0x193d   :  { %v2241_v23 = vmul.f32 %v2239_v17, %v3939_v49  ;;  %3233 = vset.pattern.permute.xlu1 %v3369_v16  ;;  %v3370_v17 = vmov 101  }
0x193e   :  { %2185 = vperm.xlu0 %3231, %v2134_v48  }
0x1940   :  { %2196 = vrot.lane.b32.xlu1 %v2194_v5, %s3349_s17 }
0x1941   :  { %v2203_v18 = vpop.permute.xlu1 %2202 }
0x1942   :  { %v2205_v28 = vmul.f32 %v2203_v18, %v3939_v49  ;;  %3232 = vset.pattern.permute.xlu0 %v3370_v17 }
0x1946   :  { %v2274_v19 = vpop.permute.xlu1 %2273 }
0x1947   :  { %v2276_v9 = vmul.f32 %v2274_v19, %v3949_v60 }
0x1998   :  { %v2249_v20 = vpop.permute.xlu1 %2248 }
0x1999   :  { %v2251_v25 = vadd.f32 %v2249_v20, %v2241_v23 }
0x199c   :  { %v2259_v21 = vpop.permute.xlu1 %2258 }
0x199d   :  { %v2213_v26 = vpop.permute.xlu0 %2212  ;;  %v2261_v29 = vadd.f32 %v2259_v21, %v2251_v25  ;;  %v3371_v25 = vmov 103  }
0x199e   :  { %v2215_v15 = vadd.f32 %v2213_v26, %v2205_v28  ;;  %v3372_v26 = vmov 104   ;;  %v3374_v28 = vmov 96  }
0x19a2   :  { %v2269_v27 = vpop.permute.xlu1 %2268 }
0x19a3   :  { %v2271_v30 = vadd.f32 %v2269_v27, %v2261_v29  ;;  %v3373_v27 = vmov 105  }
0x19a5   :  { %v2277_v34 = vadd.f32 %v2276_v9, %v2271_v30  ;;  %v3375_v30 = vmov 97   ;;  %v3378_v9 = vmov 99  }
0x19a6   :  { %v2233_v35 = vpop.permute.xlu1 %2232 }
0x19a7   :  { %v2223_v31 = vpop.permute.xlu0 %2222 }
0x19a8   :  { %v2225_v32 = vadd.f32 %v2223_v31, %v2215_v15  ;;  %v3376_v31 = vmov 100  }
0x19aa   :  { %v2235_v48 = vadd.f32 %v2233_v35, %v2225_v32  ;;  %v3377_v32 = vmov 98  }
0x19ac   :  { %v2285_v37 = vpop.permute.xlu0 %2284  ;;  %2289 = vrot.lane.b32.xlu0 %v2235_v48, %s3349_s17 }
0x19ad   :  { %v2287_v38 = vadd.f32 %v2285_v37, %v2277_v34 }
0x19af   :  { %2293 = vrot.lane.b32.xlu1 %v2287_v38, %s3346_s15 }
0x19b3   :  { %v2171_v39 = vpop.permute.xlu1 %2170 }
0x19b4   :  { %v2173_v43 = vmul.f32 %v2171_v39, %v3939_v49 }
0x19b7   :  { %v2181_v42 = vpop.permute.xlu1 %2180 }
0x19b8   :  { %v2183_v44 = vadd.f32 %v2181_v42, %v2173_v43 }
0x19b9   :  { %v2186_v40 = vpop.permute.xlu0 %2185 }
0x19ba   :  { %v2188_v50 = vmul.f32 %v2186_v40, %v3949_v60 }
0x19bb   :  { %v2197_v46 = vpop.permute.xlu1 %2196 }
0x19bc   :  { %v2189_v45 = vadd.f32 %v2188_v50, %v2183_v44 }
0x19be   :  { %v2199_v51 = vadd.f32 %v2197_v46, %v2189_v45  ;;  %v2537_v46 = vld [vmem:[%s4129_s8 + $0x28] sm:$0xff] }
0x19bf   :  { %3133 = vmatpush3.msra.mxu1 %v2537_v46 }
0x19c0   :  { %3134 = vmatprep.subr.mxu1 %v3344_v1 }
0x1a1e   :  { %v2290_v47 = vpop.permute.xlu0 %2289 }
0x1a1f   :  { %v2296_v52 = vsel %vm379_vm6, %v2199_v51, %v2290_v47  ;;  %v2536_v47 = vld [vmem:[%s4129_s8 + $0x20] sm:$0xff]  ;;  %v2535_v51 = vld [vmem:[%s4129_s8 + $0x18] sm:$0xff] }
0x1a20   :  { %3135 = vmatpush3.msra.mxu1 %v2536_v47 }
0x1a21   :  { %v2294_v53 = vpop.permute.xlu1 %2293  ;;  %3136 = vmatprep.subr.mxu1 %v3344_v1 }
0x1a22   :  { %v2297_v54 = vsel %vm300_vm5, %v2296_v52, %v2294_v53  ;;  %vm2428_vm5 = vcmask 9216   ;;  %3137 = vmatpush3.msra.mxu1 %v2535_v51 }
0x1a23   :  { %3130 = vmatmul.mubr.msk.f32.vlgmr.msra.gmra.mxu0 %vm2041_vm15, %v2297_v54  ;;  %3138 = vmatprep.subr.mxu1 %v3344_v1  ;;  %vm2641_vm15 = vcmask 228352  }
0x1a24   :  { %3155 = vmatprep.mubr.msk.f32.mxu0 %vm3345_vm1, %v3344_v1 }
0x1ae3   :  { %v2380_v57 = vpop.f32.mrf.mxu0 }
0x1ae4   :  { %v4022_v49 = vadd.f32 %v2380_v57, %v2310_v56  ;;  %v2534_v57 = vld [vmem:[%s4129_s8 + $0x10] sm:$0xff] }
0x1ae5   :  { %v3131_v36 = vpop.f32.mrf.mxu0  ;;  %3139 = vmatpush3.msra.mxu1 %v2534_v57 }
0x1ae6   :  { %v2418_v58 = vsel %vm2417_vm9, %v4022_v49, -inf  ;;  %v2402_v59 = vsel %vm2401_vm11, %v4022_v49, -inf  ;;  %v2386_v60 = vsel %vm2385_vm12, %v4022_v49, -inf  ;;  %v4035_v35 = vmax.f32 %v4022_v49, 0.0  ;;  %3140 = vmatprep.subr.mxu1 %v3344_v1  ;;  %v2532_v36 = vld [vmem:[%s4129_s8] sm:$0xff] }
0x1ae7   :  { %2419 = vmax.xlane.f32.xlu1 %v2418_v58  ;;  %2403 = vmax.xlane.f32.xlu0 %v2402_v59 }
0x1aeb   :  { %2387 = vmax.xlane.f32.xlu0 %v2386_v60 }
0x1b70   :  { %v2420_v61 = vpop.xlane.xlu1 %2419  ;;  %v2404_v62 = vpop.xlane.xlu0 %2403 }
0x1b71   :  { %v2421_v63 = vsub.f32 %v4022_v49, %v2420_v61  ;;  %v2405_v0 = vsub.f32 %v4022_v49, %v2404_v62 }
0x1b73   :  { %v2422_v33 = vmul.f32 1.442695, %v2421_v63  ;;  %v2406_v3 = vmul.f32 1.442695, %v2405_v0 }
0x1b74   :  { %v2388_v4 = vpop.xlane.xlu0 %2387 }
0x1b75   :  { %3279 = vpow2.f32 %v2422_v33  ;;  %v2389_v2 = vsub.f32 %v4022_v49, %v2388_v4  ;;  %v2533_v49 = vld [vmem:[%s4129_s8 + $0x8] sm:$0xff]  ;;  %s3382_s8 = smov 106  }
0x1b76   :  { %3281 = vpow2.f32 %v2406_v3  ;;  %3141 = vmatpush3.msra.mxu1 %v2533_v49 }
0x1b77   :  { %v2390_v5 = vmul.f32 1.442695, %v2389_v2  ;;  %3142 = vmatprep.subr.mxu1 %v3344_v1  ;;  %v1989_v2 = vld [vmem:[#allocation4 + $0x14] ss:$0 sm:$0xff] }
0x1b78   :  { %3143 = vmatpush3.msra.mxu1 %v2532_v36 }
0x1b79   :  { %3283 = vpow2.f32 %v2390_v5  ;;  %3158 = vmatprep.subr.mxu1 %v3344_v1 }
0x1b82   :  { %v3280_v6 = vpop.eup %3279 }
0x1b83   :  { %v3282_v41 = vpop.eup %3281  ;;  %2425 = vrot.lane.b32.xlu1 %v3280_v6, %s3351_s6  ;;  %s3379_s6 = smov 112  }
0x1b84   :  { %2409 = vrot.lane.b32.xlu0 %v3282_v41, %s3368_s7 }
0x1b86   :  { %v3284_v7 = vpop.eup %3283 }
0x1b87   :  { %2393 = vrot.lane.b32.xlu1 %v3284_v7, %s3347_s16 }
0x1bf5   :  { %v2426_v8 = vpop.permute.xlu1 %2425 }
0x1bf6   :  { %v2410_v10 = vpop.permute.xlu0 %2409  ;;  %v2429_v11 = vsel %vm2428_vm5, %v2426_v8, 0.0 }
0x1bf7   :  { %2430 = vadd.xlane.f32.xlu1 %v2429_v11  ;;  %v2412_v12 = vsel %vm2129_vm8, %v2410_v10, 0.0 }
0x1bf8   :  { %2413 = vadd.xlane.f32.xlu0 %v2412_v12 }
0x1bf9   :  { %v2394_v13 = vpop.permute.xlu1 %2393 }
0x1bfa   :  { %v2396_v14 = vsel %vm2129_vm8, %v2394_v13, 0.0 }
0x1bfc   :  { %2397 = vadd.xlane.f32.xlu0 %v2396_v14 }
0x1c80   :  { %v2431_v19 = vpop.xlane.xlu1 %2430 }
0x1c81   :  { %v2414_v18 = vpop.xlane.xlu0 %2413 }
0x1c82   :  { %3285 = vrcp.f32 %v2414_v18 }
0x1c83   :  { %3287 = vrcp.f32 %v2431_v19 }
0x1c85   :  { %v2398_v20 = vpop.xlane.xlu0 %2397 }
0x1c86   :  { %3289 = vrcp.f32 %v2398_v20 }
0x1c8f   :  { %v3286_v21 = vpop.eup %3285 }
0x1c90   :  { %v2416_v22 = vmul.f32 %v3286_v21, %v3282_v41  ;;  %v3288_v23 = vpop.eup %3287  ;;  %v2639_v21 = vld [vmem:[%s4130_s9 + $0x18] sm:$0xf] }
0x1c91   :  { %v2433_v24 = vmul.f32 %v3288_v23, %v3280_v6  ;;  %3148 = vmatpush3.msk.msra.mxu0 %vm87_vm0, %v2639_v21  ;;  %v2636_v23 = vld [vmem:[%s4130_s9] sm:$0xff]  ;;  %vm2727_vm0 = vcmask 1041408  }
0x1c92   :  { %2487 = vperm.xlu1 %3233, %v2416_v22   ;;  %2477 = vperm.xlu0 %3232, %v2416_v22  }
0x1c93   :  { %v3290_v29 = vpop.eup %3289  ;;  %3149 = vmatprep.subr.mxu0 %v3344_v1 }
0x1c94   :  { %v2400_v15 = vmul.f32 %v3290_v29, %v3284_v7 }
0x1c96   :  { %3234 = vset.pattern.permute.xlu1 %v3371_v25  ;;  %3240 = vset.pattern.permute.xlu0 %v3372_v26  ;;  %v2721_v25 = vld [vmem:[%s4131_s10 + $0x18] sm:$0x3]  ;;  %v2720_v26 = vld [vmem:[%s4131_s10 + $0x10] sm:$0xff] }
0x1c97   :  { %2497 = vperm.xlu1 %3234, %v2416_v22   ;;  %2508 = vperm.xlu0 %3240, %v2433_v24  }
0x1c9b   :  { %3235 = vset.pattern.permute.xlu1 %v3373_v27  ;;  %3241 = vset.pattern.permute.xlu0 %v3374_v28 }
0x1c9c   :  { %2513 = vperm.xlu1 %3235, %v2433_v24   ;;  %v2538_v24 = vld [vmem:[#allocation4 + $0x11] ss:$0 sm:$0xff] }
0x1ca0   :  { %3236 = vset.pattern.permute.xlu1 %v3375_v30 }
0x1ca1   :  { %2441 = vperm.xlu1 %3236, %v2400_v15  }
0x1ca5   :  { %3237 = vset.pattern.permute.xlu1 %v3376_v31 }
0x1ca6   :  { %2472 = vperm.xlu1 %3237, %v2416_v22   ;;  %v2637_v22 = vld [vmem:[%s4130_s9 + $0x8] sm:$0xff] }
0x1caa   :  { %3238 = vset.pattern.permute.xlu1 %v3377_v32 }
0x1cab   :  { %2451 = vperm.xlu1 %3238, %v2400_v15  }
0x1caf   :  { %3239 = vset.pattern.permute.xlu1 %v3378_v9 }
0x1cb0   :  { %2461 = vperm.xlu1 %3239, %v2400_v15  }
0x1d0d   :  { %v2488_v48 = vpop.permute.xlu1 %2487  ;;  %v2478_v34 = vpop.permute.xlu0 %2477 }
0x1d0e   :  { %v2480_v37 = vmul.f32 %v2478_v34, %v4035_v35  ;;  %v2490_v38 = vmul.f32 %v2488_v48, %v4035_v35 }
0x1d10   :  { %2482 = vrot.lane.b32.xlu1 %v2480_v37, %s3379_s6 }
0x1d12   :  { %v2498_v39 = vpop.permute.xlu1 %2497  ;;  %v2509_v59 = vpop.permute.xlu0 %2508 }
0x1d13   :  { %v2500_v40 = vmul.f32 %v2498_v39, %v4035_v35  ;;  %v2511_v3 = vmul.f32 %v2509_v59, %v4035_v35  ;;  %v2718_v39 = vld [vmem:[%s4131_s10] sm:$0xff] }
0x1d14   :  { %2492 = vrot.lane.b32.xlu1 %v2490_v38, %s3349_s17  ;;  %v2719_v38 = vld [vmem:[%s4131_s10 + $0x8] sm:$0xff] }
0x1d15   :  { %2502 = vrot.lane.b32.xlu0 %v2500_v40, %s3380_s19  ;;  %v2640_v40 = vld [vmem:[#allocation4 + $0x12] ss:$0 sm:$0xff] }
0x1d17   :  { %v2514_v42 = vpop.permute.xlu1 %2513 }
0x1d18   :  { %v2516_v43 = vmul.f32 %v2514_v42, %v4035_v35 }
0x1d19   :  { %2436 = vperm.xlu0 %3241, %v2400_v15  }
0x1d1a   :  { %2518 = vrot.lane.b32.xlu1 %v2516_v43, %s3379_s6 }
0x1d1c   :  { %v2442_v50 = vpop.permute.xlu1 %2441 }
0x1d1d   :  { %v2444_v44 = vmul.f32 %v2442_v50, %v4035_v35  ;;  %3242 = vset.pattern.permute.xlu0 %v3373_v27 }
0x1d1f   :  { %2446 = vrot.lane.b32.xlu1 %v2444_v44, %s3379_s6  ;;  %v2722_v44 = vld [vmem:[#allocation4 + $0x13] ss:$0 sm:$0xff] }
0x1d21   :  { %v2473_v45 = vpop.permute.xlu1 %2472 }
0x1d22   :  { %v2475_v60 = vmul.f32 %v2473_v45, %v4035_v35 }
0x1d26   :  { %v2452_v52 = vpop.permute.xlu1 %2451 }
0x1d27   :  { %v2454_v53 = vmul.f32 %v2452_v52, %v4035_v35 }
0x1d29   :  { %2456 = vrot.lane.b32.xlu1 %v2454_v53, %s3346_s15 }
0x1d2b   :  { %v2462_v54 = vpop.permute.xlu1 %2461 }
0x1d2c   :  { %v2464_v56 = vmul.f32 %v2462_v54, %v4035_v35 }
0x1d2e   :  { %2466 = vrot.lane.b32.xlu0 %v2464_v56, %s3381_s24 }
0x1d82   :  { %v2483_v58 = vpop.permute.xlu1 %2482 }
0x1d83   :  { %v2485_v61 = vadd.f32 %v2483_v58, %v2475_v60 }
0x1d86   :  { %v2493_v62 = vpop.permute.xlu1 %2492 }
0x1d87   :  { %v2495_v63 = vadd.f32 %v2493_v62, %v2485_v61  ;;  %v2503_v0 = vpop.permute.xlu0 %2502 }
0x1d89   :  { %v2505_v33 = vadd.f32 %v2503_v0, %v2495_v63 }
0x1d8b   :  { %2523 = vrot.lane.b32.xlu1 %v2505_v33, %s3379_s6  ;;  %s3384_s6 = smov 4  }
0x1d8c   :  { %v2519_v4 = vpop.permute.xlu1 %2518 }
0x1d8d   :  { %v2521_v5 = vadd.f32 %v2519_v4, %v2511_v3 }
0x1d8f   :  { %2527 = vrot.lane.b32.xlu0 %v2521_v5, %s3349_s17  ;;  %1991 = vrot.lane.b32.xlu1 %v1989_v2, %s3347_s16 }
0x1d91   :  { %v2447_v41 = vpop.permute.xlu1 %2446 }
0x1d94   :  { %v2437_v6 = vpop.permute.xlu0 %2436 }
0x1d95   :  { %v2439_v7 = vmul.f32 %v2437_v6, %v4035_v35 }
0x1d97   :  { %v2449_v10 = vadd.f32 %v2447_v41, %v2439_v7 }
0x1d9b   :  { %v2457_v8 = vpop.permute.xlu1 %2456 }
0x1d9c   :  { %v2459_v12 = vadd.f32 %v2457_v8, %v2449_v10 }
0x1da0   :  { %v2467_v11 = vpop.permute.xlu0 %2466 }
0x1da1   :  { %v2469_v14 = vadd.f32 %v2467_v11, %v2459_v12 }
0x1dfd   :  { %v2524_v13 = vpop.permute.xlu1 %2523 }
0x1dfe   :  { %v2530_v16 = vsel %vm180_vm10, %v2469_v14, %v2524_v13  ;;  %vm2632_vm10 = vcmask 97280  }
0x1e01   :  { %v2528_v17 = vpop.permute.xlu0 %2527  ;;  %v1992_v18 = vpop.permute.xlu1 %1991 }
0x1e02   :  { %v2531_v19 = vsel %vm379_vm6, %v2530_v16, %v2528_v17  ;;  %v1994_v20 = vadd.f32 %v1992_v18, %v3907_v55  ;;  %v2638_v55 = vld [vmem:[%s4130_s9 + $0x10] sm:$0xff]  ;;  %s3383_s9 = smov 2   ;;  %vm2630_vm6 = vcmask 80896  }
0x1e03   :  { %3145 = vmatmul.mubr.msk.f32.vlgmr.msra.gmra.mxu1 %vm2539_vm13, %v2531_v19  ;;  %3150 = vmatpush3.msra.mxu0 %v2638_v55 }
0x1e04   :  { %2615 = vrot.lane.b32.xlu0 %v1994_v20, %s3349_s17  ;;  %3166 = vmatprep.mubr.msk.f32.mxu1 %vm3345_vm1, %v3344_v1  ;;  %vm2628_vm1 = vcmask 15360  }
0x1e05   :  { %3151 = vmatprep.subr.mxu0 %v3344_v1  ;;  %3159 = vmatpush3.msk.msra.mxu1 %vm2727_vm0, %v2721_v25 }
0x1e06   :  { %3152 = vmatpush3.msra.mxu0 %v2637_v22  ;;  %3160 = vmatprep.subr.mxu1 %v3344_v1 }
0x1e07   :  { %3153 = vmatprep.subr.mxu0 %v3344_v1  ;;  %3161 = vmatpush3.msra.mxu1 %v2720_v26 }
0x1e08   :  { %2622 = vrot.lane.b32.xlu0 %v1994_v20, %s3382_s8  ;;  %3154 = vmatpush3.msra.mxu0 %v2636_v23 }
0x1e09   :  { %3162 = vmatprep.subr.mxu1 %v3344_v1 }
0x1e0a   :  { %3163 = vmatpush3.msra.mxu1 %v2719_v38 }
0x1e0b   :  { %3164 = vmatprep.subr.mxu1 %v3344_v1 }
0x1e0c   :  { %3165 = vmatpush3.msra.mxu1 %v2718_v39 }
0x1e76   :  { %v2616_v30 = vpop.permute.xlu0 %2615 }
0x1e7a   :  { %v2623_v9 = vpop.permute.xlu0 %2622 }
0x1ec3   :  { %v2609_v27 = vpop.f32.mrf.mxu1 }
0x1ec4   :  { %v2610_v28 = vadd.f32 %v2609_v27, %v2538_v24 }
0x1ec5   :  { %v3146_v29 = vpop.f32.mrf.mxu1 }
0x1ec6   :  { %v2613_v15 = vmax.f32 %v2610_v28, 0.0 }
0x1ec8   :  { %2619 = vrot.lane.b32.xlu1 %v2613_v15, %s3383_s9 }
0x1ecc   :  { %2625 = vrot.lane.b32.xlu1 %v2613_v15, %s3384_s6 }
0x1f3a   :  { %v2620_v31 = vpop.permute.xlu1 %2619 }
0x1f3b   :  { %v2629_v32 = vsel %vm2628_vm1, %v2616_v30, %v2620_v31 }
0x1f3c   :  { %v2631_v35 = vsel %vm2630_vm6, %v2629_v32, %v2623_v9 }
0x1f3e   :  { %v2626_v48 = vpop.permute.xlu1 %2625 }
0x1f3f   :  { %v2633_v34 = vsel %vm2632_vm10, %v2631_v35, %v2626_v48 }
0x1f40   :  { %v2635_v37 = vsel %vm2634_vm14, %v2633_v34, %v2626_v48 }
0x1f41   :  { %3156 = vmatmul.mubr.msk.f32.vlgmr.msra.gmra.mxu0 %vm2641_vm15, %v2635_v37 }
0x2001   :  { %v2714_v42 = vpop.f32.mrf.mxu0 }
0x2002   :  { %v2715_v43 = vadd.f32 %v2714_v42, %v2640_v40 }
0x2003   :  { %v3157_v50 = vpop.f32.mrf.mxu0 }
0x2004   :  { %3167 = vmatmul.mubr.msk.f32.vlgmr.msra.gmra.mxu1 %vm2723_vm2, %v2715_v43 }
0x20c4   :  { %v2797_v45 = vpop.f32.mrf.mxu1 }
0x20c5   :  { %v2798_v46 = vadd.f32 %v2797_v45, %v2722_v44 }
0x20c6   :  { %v3168_v47 = vpop.f32.mrf.mxu1 }
0x20c7   :  { %2808 = vrot.lane.b32.xlu0 %v2798_v46, %s3385_s22  ;;  %v2801_v1 = vsub.f32 0.0, %v2798_v46 }
0x20c9   :  { %v2802_v53 = vmul.f32 1.442695, %v2801_v1 }
0x20cb   :  { %3291 = vpow2.f32 %v2802_v53 }
0x20d8   :  { %v3292_v54 = vpop.eup %3291 }
0x20d9   :  { %v2804_v56 = vadd.f32 1.0, %v3292_v54 }
0x20db   :  { %3293 = vrcp.f32 %v2804_v56 }
0x20e8   :  { %v3294_v57 = vpop.eup %3293 }
0x20e9   :  { %v2817_v36 = vsel %vm2816_vm3, %v3294_v57, %v2798_v46 }
0x2139   :  { %v2809_v51 = vpop.permute.xlu0 %2808 }
0x213a   :  { %v2811_v52 = vsub.f32 %v2798_v46, %v2809_v51 }
0x213c   :  { %2813 = vrot.lane.b32.xlu1 %v2811_v52, %s3386_s23 }
0x21ae   :  { %v2814_v49 = vpop.permute.xlu1 %2813 }
0x21af   :  { %v2818_v58 = vsel %vm2630_vm6, %v2817_v36, %v2814_v49 }
0x21b0   :  { %2820 = vst.msk [vmem:[%s4133_s12] sm:$0x3] %vm2819_vm4, %v2818_v58 }
0x21b1   :  { %2825 = vsyncpa [#allocation3], 1 }
0x21b2   :  { %2826 = vsyncpa [#allocation5], 1 }

</bundles_post_ra>
